<compile_context>
chip_gen: v7x
topology: tpu7x:2x2x1
jax: 0.10.0
libtpu: 0.0.40
codegen_flags: <defaults>
</compile_context>

<pallas_src>
import jax
import jax.numpy as jnp
from jax.experimental import pallas as pl
from jax.experimental.pallas import tpu as pltpu

HIDDEN = 512
LANE = 128


def _round_up(x, m):
    return (x + m - 1) // m * m


def mlp_kernel(x_ref, w1_ref, b1_ref, w2_ref, b2_ref, w3_ref, b3_ref, o_ref):
    # Layer 1: (TB, F) bf16 @ (F, 512) bf16 -> f32, + bias, ReLU
    h1 = jnp.dot(x_ref[...], w1_ref[...], preferred_element_type=jnp.float32)
    h1 = jnp.maximum(h1 + b1_ref[...], 0.0)
    # Layer 2: (TB, 512) @ (512, 512) -> f32, + bias, ReLU
    h2 = jnp.dot(h1.astype(w2_ref.dtype), w2_ref[...],
                 preferred_element_type=jnp.float32)
    h2 = jnp.maximum(h2 + b2_ref[...], 0.0)
    # Layer 3: (TB, 512) @ (512, C_pad) -> f32, + bias (lane-dense 128-wide)
    out = jnp.dot(h2.astype(w3_ref.dtype), w3_ref[...],
                  preferred_element_type=jnp.float32)
    o_ref[...] = (out + b3_ref[...]).astype(o_ref.dtype)


def base_model_forward(x, params, *, tb=None):
    """x: (B, ...) -> flattened to (B, F). Returns (B, num_classes) in f32."""
    w1, b1, w2, b2, w3, b3 = params
    B = x.shape[0]
    x2d = x.reshape(B, -1)                      # nn.Flatten (glue, stays in JAX)
    F_in = x2d.shape[1]
    C = w3.shape[1]

    # Lane/sublane-friendly padded sizes.
    F_pad = _round_up(F_in, LANE)
    C_pad = _round_up(C, LANE)

    # Batch tile: multiple of 8 sublanes; cap at 256 (fills v6e/v7x MXU M dim)
    # so per-step VMEM stays small even on v7x's 64 MiB VMEM.
    if tb is None:
        tb = min(256, _round_up(B, 8))
    B_pad = _round_up(B, tb)
    grid = (B_pad // tb,)

    # bf16 weights / activations (zero-padded); f32 biases.
    x_p = jnp.zeros((B_pad, F_pad), jnp.bfloat16).at[:B, :F_in].set(
        x2d.astype(jnp.bfloat16))
    w1_p = jnp.zeros((F_pad, HIDDEN), jnp.bfloat16).at[:F_in, :].set(
        w1.astype(jnp.bfloat16))
    w2_p = w2.astype(jnp.bfloat16)
    w3_p = jnp.zeros((HIDDEN, C_pad), jnp.bfloat16).at[:, :C].set(
        w3.astype(jnp.bfloat16))
    b1_p = b1.reshape(1, HIDDEN).astype(jnp.float32)
    b2_p = b2.reshape(1, HIDDEN).astype(jnp.float32)
    b3_p = jnp.zeros((1, C_pad), jnp.float32).at[:, :C].set(
        b3.reshape(1, C).astype(jnp.float32))

    out = pl.pallas_call(
        mlp_kernel,
        out_shape=jax.ShapeDtypeStruct((B_pad, C_pad), jnp.float32),
        grid_spec=pltpu.PrefetchScalarGridSpec(
            num_scalar_prefetch=0,
            grid=grid,
            in_specs=[
                pl.BlockSpec((tb, F_pad), lambda i: (i, 0)),       # x tile (pipelined)
                pl.BlockSpec((F_pad, HIDDEN), lambda i: (0, 0)),   # w1 (resident)
                pl.BlockSpec((1, HIDDEN), lambda i: (0, 0)),       # b1
                pl.BlockSpec((HIDDEN, HIDDEN), lambda i: (0, 0)),  # w2 (resident)
                pl.BlockSpec((1, HIDDEN), lambda i: (0, 0)),       # b2
                pl.BlockSpec((HIDDEN, C_pad), lambda i: (0, 0)),   # w3 (resident)
                pl.BlockSpec((1, C_pad), lambda i: (0, 0)),        # b3
            ],
            out_specs=pl.BlockSpec((tb, C_pad), lambda i: (i, 0)),
        ),
        compiler_params=pltpu.CompilerParams(
            dimension_semantics=("parallel",)),   # megacore sharding on v7x
    )(x_p, w1_p, b1_p, w2_p, b2_p, w3_p, b3_p)

    # Strip batch and class padding.
    return out[:B, :C]


def init_params(key, num_features, num_classes):
    """Deterministic init mimicking nn.Linear's U(-1/sqrt(fan_in), 1/sqrt(fan_in))."""
    ks = jax.random.split(key, 6)

    def linear(kw, kb, fan_in, fan_out):
        bound = 1.0 / jnp.sqrt(fan_in)
        w = jax.random.uniform(kw, (fan_in, fan_out), jnp.float32, -bound, bound)
        b = jax.random.uniform(kb, (fan_out,), jnp.float32, -bound, bound)
        return w, b

    w1, b1 = linear(ks[0], ks[1], num_features, HIDDEN)
    w2, b2 = linear(ks[2], ks[3], HIDDEN, HIDDEN)
    w3, b3 = linear(ks[4], ks[5], HIDDEN, num_classes)
    return (w1, b1, w2, b2, w3, b3)


def reference_forward(x, params):
    """Full-precision f32 reference (matches the PyTorch module)."""
    w1, b1, w2, b2, w3, b3 = params
    x2d = x.reshape(x.shape[0], -1)
    h1 = jnp.maximum(x2d @ w1 + b1, 0.0)
    h2 = jnp.maximum(h1 @ w2 + b2, 0.0)
    return h2 @ w3 + b3


if __name__ == "__main__":
    key = jax.random.PRNGKey(0)
    k_x, k_p = jax.random.split(key)

    # Small example: x of shape (2, 4, 16, 16) -> 1024 features, 10 classes.
    B, C_in, H, W = 2, 4, 16, 16
    num_features = C_in * H * W
    num_classes = 10

    x = jax.random.normal(k_x, (B, C_in, H, W), jnp.float32)
    params = init_params(k_p, num_features, num_classes)

    out = base_model_forward(x, params)
    out = jax.block_until_ready(out)

    ref = reference_forward(x, params)
    assert out.shape == (B, num_classes)
    # bf16 weights/activations with f32 accumulation: loose tolerance vs f32 ref.
    assert jnp.allclose(out, ref, atol=5e-2, rtol=5e-2), "mismatch vs reference"

    print("KERNEL_OK")
</pallas_src>

<mosaic_0001>
module attributes {stable_mosaic.version = 11 : i64} {
  func.func @mlp_kernel(%arg0: i32, %arg1: memref<8x1024xbf16, #tpu.memory_space<vmem>>, %arg2: memref<1024x512xbf16, #tpu.memory_space<vmem>>, %arg3: memref<1x512xf32, #tpu.memory_space<vmem>>, %arg4: memref<512x512xbf16, #tpu.memory_space<vmem>>, %arg5: memref<1x512xf32, #tpu.memory_space<vmem>>, %arg6: memref<512x128xbf16, #tpu.memory_space<vmem>>, %arg7: memref<1x128xf32, #tpu.memory_space<vmem>>, %arg8: memref<8x128xf32, #tpu.memory_space<vmem>>) attributes {dimension_semantics = [#tpu.dimension_semantics<parallel>], iteration_bounds = array<i64: 1>, scalar_prefetch = 0 : i64, scratch_operands = 0 : i64, tpu.core_type = #tpu.core_type<tc>, window_params = [{transform_indices = @transform_0, window_bounds = array<i64: 8, 1024>}, {pipeline_mode = #tpu.pipeline_mode<synchronous>, transform_indices = @transform_1, window_bounds = array<i64: 1024, 512>}, {pipeline_mode = #tpu.pipeline_mode<synchronous>, transform_indices = @transform_2, window_bounds = array<i64: 1, 512>}, {pipeline_mode = #tpu.pipeline_mode<synchronous>, transform_indices = @transform_3, window_bounds = array<i64: 512, 512>}, {pipeline_mode = #tpu.pipeline_mode<synchronous>, transform_indices = @transform_4, window_bounds = array<i64: 1, 512>}, {pipeline_mode = #tpu.pipeline_mode<synchronous>, transform_indices = @transform_5, window_bounds = array<i64: 512, 128>}, {pipeline_mode = #tpu.pipeline_mode<synchronous>, transform_indices = @transform_6, window_bounds = array<i64: 1, 128>}, {transform_indices = @transform_7, window_bounds = array<i64: 8, 128>}]} {
    %c0 = arith.constant 0 : index
    %c0_0 = arith.constant 0 : index
    %0 = vector.load %arg1[%c0, %c0_0] : memref<8x1024xbf16, #tpu.memory_space<vmem>>, vector<8x1024xbf16>
    %c0_1 = arith.constant 0 : index
    %c0_2 = arith.constant 0 : index
    %1 = vector.load %arg2[%c0_1, %c0_2] : memref<1024x512xbf16, #tpu.memory_space<vmem>>, vector<1024x512xbf16>
    %cst = arith.constant dense<0.000000e+00> : vector<8x512xf32>
    %2 = tpu.matmul %0, %1, %cst {dimension_numbers = #tpu.dot_dimension_numbers<[1], [0], [0], [1], [0, 0, 1, 1], [], []>} : vector<8x1024xbf16>, vector<1024x512xbf16>, vector<8x512xf32> -> vector<8x512xf32>
    %c0_3 = arith.constant 0 : index
    %c0_4 = arith.constant 0 : index
    %3 = vector.load %arg3[%c0_3, %c0_4] : memref<1x512xf32, #tpu.memory_space<vmem>>, vector<1x512xf32>
    %4 = vector.broadcast %3 : vector<1x512xf32> to vector<8x512xf32>
    %5 = arith.addf %2, %4 : vector<8x512xf32>
    %cst_5 = arith.constant 0.000000e+00 : f32
    %6 = vector.broadcast %cst_5 : f32 to vector<8x512xf32>
    %7 = arith.maximumf %5, %6 : vector<8x512xf32>
    %8 = arith.truncf %7 : vector<8x512xf32> to vector<8x512xbf16>
    %c0_6 = arith.constant 0 : index
    %c0_7 = arith.constant 0 : index
    %9 = vector.load %arg4[%c0_6, %c0_7] : memref<512x512xbf16, #tpu.memory_space<vmem>>, vector<512x512xbf16>
    %cst_8 = arith.constant dense<0.000000e+00> : vector<8x512xf32>
    %10 = tpu.matmul %8, %9, %cst_8 {dimension_numbers = #tpu.dot_dimension_numbers<[1], [0], [0], [1], [0, 0, 1, 1], [], []>} : vector<8x512xbf16>, vector<512x512xbf16>, vector<8x512xf32> -> vector<8x512xf32>
    %c0_9 = arith.constant 0 : index
    %c0_10 = arith.constant 0 : index
    %11 = vector.load %arg5[%c0_9, %c0_10] : memref<1x512xf32, #tpu.memory_space<vmem>>, vector<1x512xf32>
    %12 = vector.broadcast %11 : vector<1x512xf32> to vector<8x512xf32>
    %13 = arith.addf %10, %12 : vector<8x512xf32>
    %cst_11 = arith.constant 0.000000e+00 : f32
    %14 = vector.broadcast %cst_11 : f32 to vector<8x512xf32>
    %15 = arith.maximumf %13, %14 : vector<8x512xf32>
    %16 = arith.truncf %15 : vector<8x512xf32> to vector<8x512xbf16>
    %c0_12 = arith.constant 0 : index
    %c0_13 = arith.constant 0 : index
    %17 = vector.load %arg6[%c0_12, %c0_13] : memref<512x128xbf16, #tpu.memory_space<vmem>>, vector<512x128xbf16>
    %cst_14 = arith.constant dense<0.000000e+00> : vector<8x128xf32>
    %18 = tpu.matmul %16, %17, %cst_14 {dimension_numbers = #tpu.dot_dimension_numbers<[1], [0], [0], [1], [0, 0, 1, 1], [], []>} : vector<8x512xbf16>, vector<512x128xbf16>, vector<8x128xf32> -> vector<8x128xf32>
    %c0_15 = arith.constant 0 : index
    %c0_16 = arith.constant 0 : index
    %19 = vector.load %arg7[%c0_15, %c0_16] : memref<1x128xf32, #tpu.memory_space<vmem>>, vector<1x128xf32>
    %20 = vector.broadcast %19 : vector<1x128xf32> to vector<8x128xf32>
    %21 = arith.addf %18, %20 : vector<8x128xf32>
    %c0_17 = arith.constant 0 : index
    %c0_18 = arith.constant 0 : index
    %22 = vector.load %arg8[%c0_17, %c0_18] : memref<8x128xf32, #tpu.memory_space<vmem>>, vector<8x128xf32>
    tpu.vector_store %arg8[%c0_17, %c0_18], %21 {strides = array<i32>} : memref<8x128xf32, #tpu.memory_space<vmem>>, vector<8x128xf32>,
    return
  }
  func.func @transform_0(%arg0: i32) -> (i32, i32) {
    %c0_i32 = arith.constant 0 : i32
    %c0_i32_0 = arith.constant 0 : i32
    return %arg0, %c0_i32 : i32, i32
  }
  func.func @transform_1(%arg0: i32) -> (i32, i32) {
    %c0_i32 = arith.constant 0 : i32
    %c0_i32_0 = arith.constant 0 : i32
    %c0_i32_1 = arith.constant 0 : i32
    return %c0_i32, %c0_i32_0 : i32, i32
  }
  func.func @transform_2(%arg0: i32) -> (i32, i32) {
    %c0_i32 = arith.constant 0 : i32
    %c0_i32_0 = arith.constant 0 : i32
    %c0_i32_1 = arith.constant 0 : i32
    return %c0_i32, %c0_i32_0 : i32, i32
  }
  func.func @transform_3(%arg0: i32) -> (i32, i32) {
    %c0_i32 = arith.constant 0 : i32
    %c0_i32_0 = arith.constant 0 : i32
    %c0_i32_1 = arith.constant 0 : i32
    return %c0_i32, %c0_i32_0 : i32, i32
  }
  func.func @transform_4(%arg0: i32) -> (i32, i32) {
    %c0_i32 = arith.constant 0 : i32
    %c0_i32_0 = arith.constant 0 : i32
    %c0_i32_1 = arith.constant 0 : i32
    return %c0_i32, %c0_i32_0 : i32, i32
  }
  func.func @transform_5(%arg0: i32) -> (i32, i32) {
    %c0_i32 = arith.constant 0 : i32
    %c0_i32_0 = arith.constant 0 : i32
    %c0_i32_1 = arith.constant 0 : i32
    return %c0_i32, %c0_i32_0 : i32, i32
  }
  func.func @transform_6(%arg0: i32) -> (i32, i32) {
    %c0_i32 = arith.constant 0 : i32
    %c0_i32_0 = arith.constant 0 : i32
    %c0_i32_1 = arith.constant 0 : i32
    return %c0_i32, %c0_i32_0 : i32, i32
  }
  func.func @transform_7(%arg0: i32) -> (i32, i32) {
    %c0_i32 = arith.constant 0 : i32
    %c0_i32_0 = arith.constant 0 : i32
    return %arg0, %c0_i32 : i32, i32
  }
}

</mosaic_0001>

<bundles_post_ra>
// kernel: tpu_custom_call.1
= control target key start
LH: loop header
LB: loop body
LE: loop exit
PB: predicated region body
PF: predicated region fallthrough
CT: control target
= control target key end

     0   :  { %12 = vsyncpa [#allocation3], 0  ;;  %s4755_s0 = inlined_call_operand.hbm [shape: bf16[8,1024], index: 0, kind: input, shape index: {}]   ;;  %s4756_s1 = inlined_call_operand.hbm [shape: bf16[1024,512], index: 1, kind: input, shape index: {}]   ;;  %s4757_s2 = inlined_call_operand.vmem [shape: f32[1,512], index: 2, kind: input, shape index: {}]   ;;  %s4758_s3 = inlined_call_operand.hbm [shape: bf16[512,512], index: 3, kind: input, shape index: {}]   ;;  %s4759_s4 = inlined_call_operand.vmem [shape: f32[1,512], index: 4, kind: input, shape index: {}]   ;;  %s4760_s5 = inlined_call_operand.hbm [shape: bf16[512,128], index: 5, kind: input, shape index: {}]   ;;  %s4761_s6 = inlined_call_operand.vmem [shape: f32[1,128], index: 6, kind: input, shape index: {}]   ;;  %s4762_s7 = inlined_call_operand.hbm [shape: f32[8,128], index: 7, kind: output, shape index: {}]  }
   0x1   :  { %13 = vsyncpa [#allocation6], 0 }
   0x2   :  { %14 = vsyncpa [#allocation9], 0 }
   0x3   :  { %15 = vsyncpa [#allocation4], 0  ;;  %s4582_s24 = smov [#allocation5]   ;;  %s4464_s28 = scalar_lea.hbm %s4756_s1, 32768 }
   0x4   :  { %s31_s25 = sshll.u32 %s4582_s24, 4  ;;  %p4465_p0 = scmp.ne.s32.totalorder %s4756_s1, %s4464_s28  ;;  %s32_s25 = int_to_ptr.vmem [resolvable:$true] %s31_s25 }
   0x5   :  { %p4468_p1 = scmp.lt.u32.totalorder %s4464_s28, %s4756_s1 }
   0x7   :  { %p4470_p2 = pnand %p4468_p1, %p4465_p0 }
   0x9   :  { %4473 = shalt.err (!%p4470_p2)
}
   0xa   :  { %s4474_s10 = scalar_lea.vmem %s32_s25, 32768  ;;  %p4479_p4 = scmp.lt.s32.totalorder %s32_s25, %s32_s25 }
   0xb   :  { %p4475_p3 = scmp.ne.s32.totalorder %s32_s25, %s4474_s10  ;;  %p4480_p5 = scmp.lt.s32.totalorder %s4474_s10, %s4474_s10 }
   0xd   :  { %p4481_p6 = por %p4480_p5, %p4479_p4 }
   0xf   :  { %p4482_p7 = pnand %p4481_p6, %p4475_p3 }
  0x11   :  { %4485 = shalt.err (!%p4482_p7)
}
  0x12   :  { %s4583_s11 = smov 256   ;;  %s4584_s12 = smov 16  }
  0x13   :  { %37 = dma.hbm_to_vmem [thread:$0]  %s4756_s1, 32768, %s32_s25, [#allocation6], %s4583_s11, %s4583_s11, %s4584_s12  }
  0x14   :  { %s4585_s15 = smov [#allocation2]   ;;  %s4586_s17 = smov [#allocation7]  }
  0x15   :  { %s22_s16 = sshll.u32 %s4585_s15, 4  ;;  %s45_s18 = sshll.u32 %s4586_s17, 4  ;;  %s23_s16 = int_to_ptr.vmem [resolvable:$true] %s22_s16  ;;  %s46_s18 = int_to_ptr.vmem [resolvable:$true] %s45_s18 }
  0x16   :  { %s4486_s21 = scalar_lea.hbm %s4755_s0, 512 }
  0x17   :  { %p4487_p8 = scmp.ne.s32.totalorder %s4755_s0, %s4486_s21  ;;  %p4490_p9 = scmp.lt.u32.totalorder %s4486_s21, %s4755_s0 }
  0x19   :  { %p4492_p10 = pnand %p4490_p9, %p4487_p8 }
  0x1b   :  { %4495 = shalt.err (!%p4492_p10)
}
  0x1c   :  { %s4496_s1 = scalar_lea.vmem %s23_s16, 512  ;;  %p4501_p12 = scmp.lt.s32.totalorder %s23_s16, %s23_s16 }
  0x1d   :  { %p4497_p11 = scmp.ne.s32.totalorder %s23_s16, %s4496_s1  ;;  %p4502_p13 = scmp.lt.s32.totalorder %s4496_s1, %s4496_s1 }
  0x1f   :  { %p4503_p0 = por %p4502_p13, %p4501_p12 }
  0x21   :  { %p4504_p1 = pnand %p4503_p0, %p4497_p11 }
  0x23   :  { %4507 = shalt.err (!%p4504_p1)
}
  0x24   :  { %25 = dma.hbm_to_vmem [thread:$0]  %s4755_s0, 512, %s23_s16, [#allocation3]  }
  0x25   :  { %s4508_s30 = scalar_lea.hbm %s4758_s3, 16384 }
  0x26   :  { %p4509_p2 = scmp.ne.s32.totalorder %s4758_s3, %s4508_s30  ;;  %p4512_p3 = scmp.lt.u32.totalorder %s4508_s30, %s4758_s3 }
  0x28   :  { %p4514_p4 = pnand %p4512_p3, %p4509_p2 }
  0x2a   :  { %4517 = shalt.err (!%p4514_p4)
}
  0x2b   :  { %s4518_s14 = scalar_lea.vmem %s46_s18, 16384  ;;  %p4523_p6 = scmp.lt.s32.totalorder %s46_s18, %s46_s18 }
  0x2c   :  { %p4519_p5 = scmp.ne.s32.totalorder %s46_s18, %s4518_s14  ;;  %p4524_p7 = scmp.lt.s32.totalorder %s4518_s14, %s4518_s14 }
  0x2e   :  { %p4525_p8 = por %p4524_p7, %p4523_p6 }
  0x30   :  { %p4526_p9 = pnand %p4525_p8, %p4519_p5 }
  0x32   :  { %4529 = shalt.err (!%p4526_p9)
}
  0x33   :  { %51 = dma.hbm_to_vmem [thread:$0]  %s4758_s3, 16384, %s46_s18, [#allocation6], %s4583_s11, %s4583_s11, %s4584_s12  }
  0x34   :  { %s4587_s16 = smov [#allocation8]   ;;  %s4530_s21 = scalar_lea.hbm %s4760_s5, 4096 }
  0x35   :  { %s59_s17 = sshll.u32 %s4587_s16, 4  ;;  %p4531_p10 = scmp.ne.s32.totalorder %s4760_s5, %s4530_s21  ;;  %s60_s17 = int_to_ptr.vmem [resolvable:$true] %s59_s17 }
  0x36   :  { %p4534_p11 = scmp.lt.u32.totalorder %s4530_s21, %s4760_s5 }
  0x38   :  { %p4536_p12 = pnand %p4534_p11, %p4531_p10 }
  0x3a   :  { %4539 = shalt.err (!%p4536_p12)
}
  0x3b   :  { %s4540_s1 = scalar_lea.vmem %s60_s17, 4096  ;;  %p4545_p0 = scmp.lt.s32.totalorder %s60_s17, %s60_s17 }
  0x3c   :  { %p4541_p13 = scmp.ne.s32.totalorder %s60_s17, %s4540_s1  ;;  %p4546_p1 = scmp.lt.s32.totalorder %s4540_s1, %s4540_s1 }
  0x3e   :  { %p4547_p2 = por %p4546_p1, %p4545_p0 }
  0x40   :  { %p4548_p3 = pnand %p4547_p2, %p4541_p13 }
  0x42   :  { %4551 = shalt.err (!%p4548_p3)
}
  0x43   :  { %s4588_s3 = smov 64   ;;  %s4589_s11 = smov 4  }
  0x44   :  { %65 = dma.hbm_to_vmem [thread:$0]  %s4760_s5, 4096, %s60_s17, [#allocation9], %s4588_s3, %s4588_s3, %s4589_s11  }
  0x45   :  { %4574 = dma.done.wait [#allocation3], 512  }
  0x46   :  { %4575 = vsyncadd [#allocation3], 4294966784 }
  0x47   :  { %4576 = dma.done.wait [#allocation6], 49152  }
  0x48   :  { %4577 = vsyncadd [#allocation6], 4294918144 }
  0x49   :  { %4578 = dma.done.wait [#allocation9], 4096  }
  0x4a   :  { %4579 = vsyncadd [#allocation9], 4294963200  ;;  %v3848_v0 = vld [vmem:[#allocation5 + $0x4] ss:$16 sps:$4 sm:$0xff]   ;;  %v3850_v1 = vld [vmem:[#allocation5 + $0xc] ss:$16 sps:$4 sm:$0xff]  }
  0x4b   :  { %1671 = vmatprep.subr.bf16.mxu0 %v3848_v0  ;;  %v3852_v2 = vld [vmem:[#allocation5] ss:$16 sps:$4 sm:$0xff]   ;;  %v3853_v3 = vld [vmem:[#allocation5 + $0x8] ss:$16 sps:$4 sm:$0xff]   ;;  %1835 = vmatprep.subr.bf16.mxu1 %v3850_v1  ;;  %v3854_v4 = vld [vmem:[#allocation5 + $0x24] ss:$16 sps:$4 sm:$0xff]  }
  0x4c   :  { %1672 = vmatpush1.bf16.msra.mxu0 %v3852_v2  ;;  %1836 = vmatpush1.bf16.msra.mxu1 %v3853_v3  ;;  %v3856_v5 = vld [vmem:[#allocation5 + $0x2c] ss:$16 sps:$4 sm:$0xff]   ;;  %v3858_v6 = vld [vmem:[#allocation5 + $0x20] ss:$16 sps:$4 sm:$0xff]   ;;  %v3859_v7 = vld [vmem:[#allocation5 + $0x28] ss:$16 sps:$4 sm:$0xff]  }
  0x4d   :  { %1673 = vmatprep.subr.bf16.mxu0 %v3854_v4  ;;  %1837 = vmatprep.subr.bf16.mxu1 %v3856_v5  ;;  %v3860_v8 = vld [vmem:[#allocation5 + $0x44] ss:$16 sps:$4 sm:$0xff]   ;;  %v3862_v9 = vld [vmem:[#allocation5 + $0x4c] ss:$16 sps:$4 sm:$0xff]   ;;  %v3864_v10 = vld [vmem:[#allocation5 + $0x40] ss:$16 sps:$4 sm:$0xff]  }
  0x4e   :  { %v3865_v11 = vld [vmem:[#allocation5 + $0x48] ss:$16 sps:$4 sm:$0xff]   ;;  %v3866_v12 = vld [vmem:[#allocation5 + $0x64] ss:$16 sps:$4 sm:$0xff]   ;;  %v3868_v13 = vld [vmem:[#allocation5 + $0x6c] ss:$16 sps:$4 sm:$0xff]  }
  0x4f   :  { %v3870_v14 = vld [vmem:[#allocation5 + $0x60] ss:$16 sps:$4 sm:$0xff]   ;;  %v3871_v15 = vld [vmem:[#allocation5 + $0x68] ss:$16 sps:$4 sm:$0xff]   ;;  %v3872_v16 = vld [vmem:[#allocation5 + $0x84] ss:$16 sps:$4 sm:$0xff]  }
  0x50   :  { %1674 = vmatpush1.bf16.msra.mxu0 %v3858_v6  ;;  %1838 = vmatpush1.bf16.msra.mxu1 %v3859_v7  ;;  %v3874_v17 = vld [vmem:[#allocation5 + $0x8c] ss:$16 sps:$4 sm:$0xff]   ;;  %v3876_v18 = vld [vmem:[#allocation5 + $0x80] ss:$16 sps:$4 sm:$0xff]   ;;  %v3877_v19 = vld [vmem:[#allocation5 + $0x88] ss:$16 sps:$4 sm:$0xff]  }
  0x51   :  { %1675 = vmatprep.subr.bf16.mxu0 %v3860_v8  ;;  %1839 = vmatprep.subr.bf16.mxu1 %v3862_v9  ;;  %v3878_v20 = vld [vmem:[#allocation5 + $0xa4] ss:$16 sps:$4 sm:$0xff]   ;;  %v3880_v21 = vld [vmem:[#allocation5 + $0xac] ss:$16 sps:$4 sm:$0xff]   ;;  %v3882_v22 = vld [vmem:[#allocation5 + $0xa0] ss:$16 sps:$4 sm:$0xff]  }
  0x52   :  { %v3883_v23 = vld [vmem:[#allocation5 + $0xa8] ss:$16 sps:$4 sm:$0xff]   ;;  %v3884_v24 = vld [vmem:[#allocation5 + $0xc4] ss:$16 sps:$4 sm:$0xff]   ;;  %v3886_v25 = vld [vmem:[#allocation5 + $0xcc] ss:$16 sps:$4 sm:$0xff]  }
  0x53   :  { %v3888_v26 = vld [vmem:[#allocation5 + $0xc0] ss:$16 sps:$4 sm:$0xff]   ;;  %v3889_v27 = vld [vmem:[#allocation5 + $0xc8] ss:$16 sps:$4 sm:$0xff]   ;;  %v3890_v28 = vld [vmem:[#allocation5 + $0xe4] ss:$16 sps:$4 sm:$0xff]  }
  0x54   :  { %1676 = vmatpush1.bf16.msra.mxu0 %v3864_v10  ;;  %1840 = vmatpush1.bf16.msra.mxu1 %v3865_v11  ;;  %v3892_v29 = vld [vmem:[#allocation5 + $0xec] ss:$16 sps:$4 sm:$0xff]   ;;  %v3894_v30 = vld [vmem:[#allocation5 + $0xe0] ss:$16 sps:$4 sm:$0xff]   ;;  %v3895_v31 = vld [vmem:[#allocation5 + $0xe8] ss:$16 sps:$4 sm:$0xff]  }
  0x55   :  { %1677 = vmatprep.subr.bf16.mxu0 %v3866_v12  ;;  %1841 = vmatprep.subr.bf16.mxu1 %v3868_v13  ;;  %v3896_v32 = vld [vmem:[#allocation5 + $0x104] ss:$16 sps:$4 sm:$0xff]   ;;  %v3898_v33 = vld [vmem:[#allocation5 + $0x10c] ss:$16 sps:$4 sm:$0xff]   ;;  %v3900_v34 = vld [vmem:[#allocation5 + $0x100] ss:$16 sps:$4 sm:$0xff]  }
  0x56   :  { %v3901_v35 = vld [vmem:[#allocation5 + $0x108] ss:$16 sps:$4 sm:$0xff]   ;;  %v3902_v36 = vld [vmem:[#allocation5 + $0x124] ss:$16 sps:$4 sm:$0xff]   ;;  %v3904_v37 = vld [vmem:[#allocation5 + $0x12c] ss:$16 sps:$4 sm:$0xff]  }
  0x57   :  { %v3906_v38 = vld [vmem:[#allocation5 + $0x120] ss:$16 sps:$4 sm:$0xff]   ;;  %v3907_v39 = vld [vmem:[#allocation5 + $0x128] ss:$16 sps:$4 sm:$0xff]   ;;  %v3908_v40 = vld [vmem:[#allocation5 + $0x144] ss:$16 sps:$4 sm:$0xff]  }
  0x58   :  { %1678 = vmatpush1.bf16.msra.mxu0 %v3870_v14  ;;  %1842 = vmatpush1.bf16.msra.mxu1 %v3871_v15  ;;  %v3910_v41 = vld [vmem:[#allocation5 + $0x14c] ss:$16 sps:$4 sm:$0xff]   ;;  %v3912_v42 = vld [vmem:[#allocation5 + $0x140] ss:$16 sps:$4 sm:$0xff]   ;;  %v3913_v43 = vld [vmem:[#allocation5 + $0x148] ss:$16 sps:$4 sm:$0xff]  }
  0x59   :  { %1679 = vmatprep.subr.bf16.mxu0 %v3872_v16  ;;  %1843 = vmatprep.subr.bf16.mxu1 %v3874_v17  ;;  %v3914_v44 = vld [vmem:[#allocation5 + $0x164] ss:$16 sps:$4 sm:$0xff]   ;;  %v3916_v45 = vld [vmem:[#allocation5 + $0x16c] ss:$16 sps:$4 sm:$0xff]   ;;  %v3918_v47 = vld [vmem:[#allocation5 + $0x160] ss:$16 sps:$4 sm:$0xff]  }
  0x5a   :  { %v81_v46 = vld [vmem:[#allocation2] sm:$0xff]  ;;  %v3919_v49 = vld [vmem:[#allocation5 + $0x168] ss:$16 sps:$4 sm:$0xff]   ;;  %v3922_v51 = vld [vmem:[#allocation5 + $0x18c] ss:$16 sps:$4 sm:$0xff]   ;;  %s4590_s29 = smov [#allocation10]  }
  0x5b   :  { %v3331_v48 = vcombine.high %v81_v46, %v81_v46  ;;  %v3920_v50 = vld [vmem:[#allocation5 + $0x184] ss:$16 sps:$4 sm:$0xff]   ;;  %v3924_v52 = vld [vmem:[#allocation5 + $0x180] ss:$16 sps:$4 sm:$0xff]   ;;  %v3925_v53 = vld [vmem:[#allocation5 + $0x188] ss:$16 sps:$4 sm:$0xff]   ;;  %v3330_v4 = vcombine.low %v81_v46, %v81_v46 }
  0x5c   :  { %1680 = vmatpush1.bf16.msra.mxu0 %v3876_v18  ;;  %1844 = vmatpush1.bf16.msra.mxu1 %v3877_v19  ;;  %v3926_v54 = vld [vmem:[#allocation5 + $0x1a4] ss:$16 sps:$4 sm:$0xff]   ;;  %v3928_v55 = vld [vmem:[#allocation5 + $0x1ac] ss:$16 sps:$4 sm:$0xff]   ;;  %v3930_v56 = vld [vmem:[#allocation5 + $0x1a0] ss:$16 sps:$4 sm:$0xff]  }
  0x5d   :  { %1681 = vmatprep.subr.bf16.mxu0 %v3878_v20  ;;  %1845 = vmatprep.subr.bf16.mxu1 %v3880_v21  ;;  %v3931_v57 = vld [vmem:[#allocation5 + $0x1a8] ss:$16 sps:$4 sm:$0xff]   ;;  %v3932_v58 = vld [vmem:[#allocation5 + $0x1c4] ss:$16 sps:$4 sm:$0xff]   ;;  %v3934_v59 = vld [vmem:[#allocation5 + $0x1cc] ss:$16 sps:$4 sm:$0xff]  }
  0x5e   :  { %1703 = vmatprep.mubr.bf16.mxu0 %v3331_v48  ;;  %1867 = vmatprep.mubr.bf16.mxu1 %v3331_v48  ;;  %v3936_v60 = vld [vmem:[#allocation5 + $0x1c0] ss:$16 sps:$4 sm:$0xff]   ;;  %v3937_v61 = vld [vmem:[#allocation5 + $0x1c8] ss:$16 sps:$4 sm:$0xff]   ;;  %v3938_v62 = vld [vmem:[#allocation5 + $0x1e4] ss:$16 sps:$4 sm:$0xff]  }
  0x5f   :  { %v3940_v63 = vld [vmem:[#allocation5 + $0x1ec] ss:$16 sps:$4 sm:$0xff]   ;;  %v3942_v0 = vld [vmem:[#allocation5 + $0x1e0] ss:$16 sps:$4 sm:$0xff]   ;;  %v3943_v1 = vld [vmem:[#allocation5 + $0x1e8] ss:$16 sps:$4 sm:$0xff]  }
  0x60   :  { %1682 = vmatpush1.bf16.msra.mxu0 %v3882_v22  ;;  %1846 = vmatpush1.bf16.msra.mxu1 %v3883_v23  ;;  %v3948_v2 = vld [vmem:[#allocation5 + $0x204] ss:$16 sps:$4 sm:$0xff]   ;;  %v3951_v3 = vld [vmem:[#allocation5 + $0x20c] ss:$16 sps:$4 sm:$0xff]   ;;  %v3946_v5 = vld [vmem:[#allocation5 + $0x200] ss:$16 sps:$4 sm:$0xff]  }
  0x61   :  { %1683 = vmatprep.subr.bf16.mxu0 %v3884_v24  ;;  %1847 = vmatprep.subr.bf16.mxu1 %v3886_v25  ;;  %v3949_v6 = vld [vmem:[#allocation5 + $0x208] ss:$16 sps:$4 sm:$0xff]   ;;  %v3954_v7 = vld [vmem:[#allocation5 + $0x224] ss:$16 sps:$4 sm:$0xff]   ;;  %v3957_v8 = vld [vmem:[#allocation5 + $0x22c] ss:$16 sps:$4 sm:$0xff]  }
  0x62   :  { %v3952_v9 = vld [vmem:[#allocation5 + $0x220] ss:$16 sps:$4 sm:$0xff]   ;;  %v3955_v10 = vld [vmem:[#allocation5 + $0x228] ss:$16 sps:$4 sm:$0xff]   ;;  %v3960_v11 = vld [vmem:[#allocation5 + $0x244] ss:$16 sps:$4 sm:$0xff]  }
  0x63   :  { %v3963_v12 = vld [vmem:[#allocation5 + $0x24c] ss:$16 sps:$4 sm:$0xff]   ;;  %v3958_v13 = vld [vmem:[#allocation5 + $0x240] ss:$16 sps:$4 sm:$0xff]   ;;  %v3961_v14 = vld [vmem:[#allocation5 + $0x248] ss:$16 sps:$4 sm:$0xff]  }
  0x64   :  { %1684 = vmatpush1.bf16.msra.mxu0 %v3888_v26  ;;  %1848 = vmatpush1.bf16.msra.mxu1 %v3889_v27  ;;  %v3966_v15 = vld [vmem:[#allocation5 + $0x264] ss:$16 sps:$4 sm:$0xff]   ;;  %v3969_v16 = vld [vmem:[#allocation5 + $0x26c] ss:$16 sps:$4 sm:$0xff]   ;;  %v3964_v17 = vld [vmem:[#allocation5 + $0x260] ss:$16 sps:$4 sm:$0xff]  }
  0x65   :  { %1685 = vmatprep.subr.bf16.mxu0 %v3890_v28  ;;  %1849 = vmatprep.subr.bf16.mxu1 %v3892_v29  ;;  %v3967_v18 = vld [vmem:[#allocation5 + $0x268] ss:$16 sps:$4 sm:$0xff]   ;;  %v3972_v19 = vld [vmem:[#allocation5 + $0x284] ss:$16 sps:$4 sm:$0xff]   ;;  %v3975_v20 = vld [vmem:[#allocation5 + $0x28c] ss:$16 sps:$4 sm:$0xff]  }
  0x66   :  { %v3970_v21 = vld [vmem:[#allocation5 + $0x280] ss:$16 sps:$4 sm:$0xff]   ;;  %v3973_v22 = vld [vmem:[#allocation5 + $0x288] ss:$16 sps:$4 sm:$0xff]   ;;  %v3978_v23 = vld [vmem:[#allocation5 + $0x2a4] ss:$16 sps:$4 sm:$0xff]  }
  0x67   :  { %v3981_v24 = vld [vmem:[#allocation5 + $0x2ac] ss:$16 sps:$4 sm:$0xff]   ;;  %v3976_v25 = vld [vmem:[#allocation5 + $0x2a0] ss:$16 sps:$4 sm:$0xff]   ;;  %v3979_v26 = vld [vmem:[#allocation5 + $0x2a8] ss:$16 sps:$4 sm:$0xff]  }
  0x68   :  { %1686 = vmatpush1.bf16.msra.mxu0 %v3894_v30  ;;  %1850 = vmatpush1.bf16.msra.mxu1 %v3895_v31  ;;  %v3984_v27 = vld [vmem:[#allocation5 + $0x2c4] ss:$16 sps:$4 sm:$0xff]   ;;  %v3987_v28 = vld [vmem:[#allocation5 + $0x2cc] ss:$16 sps:$4 sm:$0xff]   ;;  %v3982_v31 = vld [vmem:[#allocation5 + $0x2c0] ss:$16 sps:$4 sm:$0xff]  }
  0x69   :  { %1687 = vmatprep.subr.bf16.mxu0 %v3896_v32  ;;  %1851 = vmatprep.subr.bf16.mxu1 %v3898_v33  ;;  %v4685_v29 = vld [vmem:[#allocation2 + $0x8] sm:$0xff]  ;;  %v3990_v33 = vld [vmem:[#allocation5 + $0x2e4] ss:$16 sps:$4 sm:$0xff]   ;;  %s3319_s30 = sshll.u32 %s4590_s29, 4  ;;  %s3320_s30 = int_to_ptr.vmem [resolvable:$true] %s3319_s30 }
  0x6a   :  { %v3333_v30 = vcombine.high %v4685_v29, %v4685_v29  ;;  %v3985_v32 = vld [vmem:[#allocation5 + $0x2c8] ss:$16 sps:$4 sm:$0xff]   ;;  %v4011_v46 = vld [vmem:[#allocation5 + $0x34c] ss:$16 sps:$4 sm:$0xff]   ;;  %s4552_s8 = scalar_lea.vmem %s3320_s30, 128  ;;  %p4557_p5 = scmp.lt.s32.totalorder %s3320_s30, %s3320_s30 }
  0x6b   :  { %v4009_v48 = vld [vmem:[#allocation5 + $0x348] ss:$16 sps:$4 sm:$0xff]   ;;  %p4553_p4 = scmp.ne.s32.totalorder %s3320_s30, %s4552_s8  ;;  %p4558_p6 = scmp.lt.s32.totalorder %s4552_s8, %s4552_s8 }
  0x6c   :  { %1688 = vmatpush1.bf16.msra.mxu0 %v3900_v34  ;;  %1852 = vmatpush1.bf16.msra.mxu1 %v3901_v35  ;;  %v3993_v34 = vld [vmem:[#allocation5 + $0x2ec] ss:$16 sps:$4 sm:$0xff]   ;;  %v3988_v35 = vld [vmem:[#allocation5 + $0x2e0] ss:$16 sps:$4 sm:$0xff]  }
  0x6d   :  { %1689 = vmatprep.subr.bf16.mxu0 %v3902_v36  ;;  %1853 = vmatprep.subr.bf16.mxu1 %v3904_v37  ;;  %v3991_v36 = vld [vmem:[#allocation5 + $0x2e8] ss:$16 sps:$4 sm:$0xff]   ;;  %v3996_v37 = vld [vmem:[#allocation5 + $0x304] ss:$16 sps:$4 sm:$0xff]   ;;  %p4559_p7 = por %p4558_p6, %p4557_p5 }
  0x6f   :  { %p4560_p8 = pnand %p4559_p7, %p4553_p4 }
  0x70   :  { %1690 = vmatpush1.bf16.msra.mxu0 %v3906_v38  ;;  %1854 = vmatpush1.bf16.msra.mxu1 %v3907_v39  ;;  %v3999_v38 = vld [vmem:[#allocation5 + $0x30c] ss:$16 sps:$4 sm:$0xff]   ;;  %v3994_v39 = vld [vmem:[#allocation5 + $0x300] ss:$16 sps:$4 sm:$0xff]  }
  0x71   :  { %1691 = vmatprep.subr.bf16.mxu0 %v3908_v40  ;;  %1855 = vmatprep.subr.bf16.mxu1 %v3910_v41  ;;  %v3997_v40 = vld [vmem:[#allocation5 + $0x308] ss:$16 sps:$4 sm:$0xff]   ;;  %v4002_v41 = vld [vmem:[#allocation5 + $0x324] ss:$16 sps:$4 sm:$0xff]  }
  0x74   :  { %1692 = vmatpush1.bf16.msra.mxu0 %v3912_v42  ;;  %1856 = vmatpush1.bf16.msra.mxu1 %v3913_v43  ;;  %v4005_v42 = vld [vmem:[#allocation5 + $0x32c] ss:$16 sps:$4 sm:$0xff]   ;;  %v4000_v43 = vld [vmem:[#allocation5 + $0x320] ss:$16 sps:$4 sm:$0xff]  }
  0x75   :  { %1693 = vmatprep.subr.bf16.mxu0 %v3914_v44  ;;  %1857 = vmatprep.subr.bf16.mxu1 %v3916_v45  ;;  %v4003_v44 = vld [vmem:[#allocation5 + $0x328] ss:$16 sps:$4 sm:$0xff]   ;;  %v4008_v45 = vld [vmem:[#allocation5 + $0x344] ss:$16 sps:$4 sm:$0xff]  }
  0x78   :  { %1694 = vmatpush1.bf16.msra.mxu0 %v3918_v47  ;;  %1858 = vmatpush1.bf16.msra.mxu1 %v3919_v49  ;;  %v4006_v47 = vld [vmem:[#allocation5 + $0x340] ss:$16 sps:$4 sm:$0xff]   ;;  %v4014_v49 = vld [vmem:[#allocation5 + $0x364] ss:$16 sps:$4 sm:$0xff]  }
  0x79   :  { %1695 = vmatprep.subr.bf16.mxu0 %v3920_v50  ;;  %1859 = vmatprep.subr.bf16.mxu1 %v3922_v51  ;;  %v4017_v50 = vld [vmem:[#allocation5 + $0x36c] ss:$16 sps:$4 sm:$0xff]   ;;  %v4012_v51 = vld [vmem:[#allocation5 + $0x360] ss:$16 sps:$4 sm:$0xff]  }
  0x7c   :  { %1696 = vmatpush1.bf16.msra.mxu0 %v3924_v52  ;;  %1860 = vmatpush1.bf16.msra.mxu1 %v3925_v53  ;;  %v4015_v52 = vld [vmem:[#allocation5 + $0x368] ss:$16 sps:$4 sm:$0xff]   ;;  %v4020_v53 = vld [vmem:[#allocation5 + $0x384] ss:$16 sps:$4 sm:$0xff]  }
  0x7d   :  { %1697 = vmatprep.subr.bf16.mxu0 %v3926_v54  ;;  %1861 = vmatprep.subr.bf16.mxu1 %v3928_v55  ;;  %v4023_v54 = vld [vmem:[#allocation5 + $0x38c] ss:$16 sps:$4 sm:$0xff]   ;;  %v4018_v55 = vld [vmem:[#allocation5 + $0x380] ss:$16 sps:$4 sm:$0xff]  }
  0x80   :  { %1698 = vmatpush1.bf16.msra.mxu0 %v3930_v56  ;;  %1862 = vmatpush1.bf16.msra.mxu1 %v3931_v57  ;;  %v4021_v56 = vld [vmem:[#allocation5 + $0x388] ss:$16 sps:$4 sm:$0xff]   ;;  %v4026_v57 = vld [vmem:[#allocation5 + $0x3a4] ss:$16 sps:$4 sm:$0xff]  }
  0x81   :  { %1699 = vmatprep.subr.bf16.mxu0 %v3932_v58  ;;  %1863 = vmatprep.subr.bf16.mxu1 %v3934_v59  ;;  %v4029_v58 = vld [vmem:[#allocation5 + $0x3ac] ss:$16 sps:$4 sm:$0xff]   ;;  %v4024_v59 = vld [vmem:[#allocation5 + $0x3a0] ss:$16 sps:$4 sm:$0xff]  }
  0x84   :  { %1700 = vmatpush1.bf16.msra.mxu0 %v3936_v60  ;;  %1864 = vmatpush1.bf16.msra.mxu1 %v3937_v61  ;;  %v4027_v60 = vld [vmem:[#allocation5 + $0x3a8] ss:$16 sps:$4 sm:$0xff]   ;;  %v4032_v61 = vld [vmem:[#allocation5 + $0x3c4] ss:$16 sps:$4 sm:$0xff]  }
  0x85   :  { %1701 = vmatprep.subr.bf16.mxu0 %v3938_v62  ;;  %1865 = vmatprep.subr.bf16.mxu1 %v3940_v63  ;;  %v4035_v62 = vld [vmem:[#allocation5 + $0x3cc] ss:$16 sps:$4 sm:$0xff]   ;;  %v4030_v63 = vld [vmem:[#allocation5 + $0x3c0] ss:$16 sps:$4 sm:$0xff]  }
  0x88   :  { %1702 = vmatpush1.bf16.msra.mxu0 %v3942_v0  ;;  %1866 = vmatpush1.bf16.msra.mxu1 %v3943_v1  ;;  %v4033_v0 = vld [vmem:[#allocation5 + $0x3c8] ss:$16 sps:$4 sm:$0xff]   ;;  %v4038_v1 = vld [vmem:[#allocation5 + $0x3e4] ss:$16 sps:$4 sm:$0xff]  }
  0x89   :  { %1712 = vmatprep.subr.bf16.mxu0 %v3948_v2  ;;  %1876 = vmatprep.subr.bf16.mxu1 %v3951_v3  ;;  %v4041_v2 = vld [vmem:[#allocation5 + $0x3ec] ss:$16 sps:$4 sm:$0xff]   ;;  %v4036_v3 = vld [vmem:[#allocation5 + $0x3e0] ss:$16 sps:$4 sm:$0xff]  }
  0x8b   :  { %1704 = vmatmul.mubr.bf16.vlgmr.msra.gmra.mrb[0].mxu0 %v3330_v4  ;;  %1868 = vmatmul.mubr.bf16.vlgmr.msra.gmra.mrb[0].mxu1 %v3330_v4  ;;  %v4039_v4 = vld [vmem:[#allocation5 + $0x3e8] ss:$16 sps:$4 sm:$0xff]  }
  0x8c   :  { %1713 = vmatpush1.bf16.msra.mxu0 %v3946_v5  ;;  %1877 = vmatpush1.bf16.msra.mxu1 %v3949_v6  ;;  %v4046_v5 = vld [vmem:[#allocation5 + $0x404] ss:$16 sps:$4 sm:$0xff]   ;;  %v4049_v6 = vld [vmem:[#allocation5 + $0x40c] ss:$16 sps:$4 sm:$0xff]  }
  0x8d   :  { %1714 = vmatprep.subr.bf16.mxu0 %v3954_v7  ;;  %1878 = vmatprep.subr.bf16.mxu1 %v3957_v8  ;;  %v3332_v7 = vcombine.low %v4685_v29, %v4685_v29  ;;  %v4044_v8 = vld [vmem:[#allocation5 + $0x400] ss:$16 sps:$4 sm:$0xff]   ;;  %v4079_v29 = vld [vmem:[#allocation5 + $0x4ac] ss:$16 sps:$4 sm:$0xff]  }
  0x8e   :  { %1744 = vmatprep.mubr.bf16.mxu0 %v3333_v30  ;;  %1908 = vmatprep.mubr.bf16.mxu1 %v3333_v30  ;;  %v4074_v30 = vld [vmem:[#allocation5 + $0x4a0] ss:$16 sps:$4 sm:$0xff]  }
  0x90   :  { %1715 = vmatpush1.bf16.msra.mxu0 %v3952_v9  ;;  %1879 = vmatpush1.bf16.msra.mxu1 %v3955_v10  ;;  %v4047_v9 = vld [vmem:[#allocation5 + $0x408] ss:$16 sps:$4 sm:$0xff]   ;;  %v4052_v10 = vld [vmem:[#allocation5 + $0x424] ss:$16 sps:$4 sm:$0xff]  }
  0x91   :  { %1716 = vmatprep.subr.bf16.mxu0 %v3960_v11  ;;  %1880 = vmatprep.subr.bf16.mxu1 %v3963_v12  ;;  %v4691_v11 = vld [vmem:[#allocation2 + $0x10] sm:$0xff]  ;;  %v4055_v12 = vld [vmem:[#allocation5 + $0x42c] ss:$16 sps:$4 sm:$0xff]  }
  0x94   :  { %1717 = vmatpush1.bf16.msra.mxu0 %v3958_v13  ;;  %1881 = vmatpush1.bf16.msra.mxu1 %v3961_v14  ;;  %v3335_v13 = vcombine.high %v4691_v11, %v4691_v11  ;;  %v4050_v14 = vld [vmem:[#allocation5 + $0x420] ss:$16 sps:$4 sm:$0xff]  }
  0x95   :  { %1718 = vmatprep.subr.bf16.mxu0 %v3966_v15  ;;  %1882 = vmatprep.subr.bf16.mxu1 %v3969_v16  ;;  %v4053_v15 = vld [vmem:[#allocation5 + $0x428] ss:$16 sps:$4 sm:$0xff]   ;;  %v4058_v16 = vld [vmem:[#allocation5 + $0x444] ss:$16 sps:$4 sm:$0xff]  }
  0x98   :  { %1719 = vmatpush1.bf16.msra.mxu0 %v3964_v17  ;;  %1883 = vmatpush1.bf16.msra.mxu1 %v3967_v18  ;;  %v4061_v17 = vld [vmem:[#allocation5 + $0x44c] ss:$16 sps:$4 sm:$0xff]   ;;  %v4056_v18 = vld [vmem:[#allocation5 + $0x440] ss:$16 sps:$4 sm:$0xff]  }
  0x99   :  { %1720 = vmatprep.subr.bf16.mxu0 %v3972_v19  ;;  %1884 = vmatprep.subr.bf16.mxu1 %v3975_v20  ;;  %v4059_v19 = vld [vmem:[#allocation5 + $0x448] ss:$16 sps:$4 sm:$0xff]   ;;  %v4064_v20 = vld [vmem:[#allocation5 + $0x464] ss:$16 sps:$4 sm:$0xff]  }
  0x9c   :  { %1721 = vmatpush1.bf16.msra.mxu0 %v3970_v21  ;;  %1885 = vmatpush1.bf16.msra.mxu1 %v3973_v22  ;;  %v4067_v21 = vld [vmem:[#allocation5 + $0x46c] ss:$16 sps:$4 sm:$0xff]   ;;  %v4062_v22 = vld [vmem:[#allocation5 + $0x460] ss:$16 sps:$4 sm:$0xff]  }
  0x9d   :  { %1722 = vmatprep.subr.bf16.mxu0 %v3978_v23  ;;  %1886 = vmatprep.subr.bf16.mxu1 %v3981_v24  ;;  %v4065_v23 = vld [vmem:[#allocation5 + $0x468] ss:$16 sps:$4 sm:$0xff]   ;;  %v4070_v24 = vld [vmem:[#allocation5 + $0x484] ss:$16 sps:$4 sm:$0xff]  }
  0xa0   :  { %1723 = vmatpush1.bf16.msra.mxu0 %v3976_v25  ;;  %1887 = vmatpush1.bf16.msra.mxu1 %v3979_v26  ;;  %v4073_v25 = vld [vmem:[#allocation5 + $0x48c] ss:$16 sps:$4 sm:$0xff]   ;;  %v4068_v26 = vld [vmem:[#allocation5 + $0x480] ss:$16 sps:$4 sm:$0xff]  }
  0xa1   :  { %1724 = vmatprep.subr.bf16.mxu0 %v3984_v27  ;;  %1888 = vmatprep.subr.bf16.mxu1 %v3987_v28  ;;  %v4071_v27 = vld [vmem:[#allocation5 + $0x488] ss:$16 sps:$4 sm:$0xff]   ;;  %v4076_v28 = vld [vmem:[#allocation5 + $0x4a4] ss:$16 sps:$4 sm:$0xff]  }
  0xa4   :  { %1725 = vmatpush1.bf16.msra.mxu0 %v3982_v31  ;;  %1889 = vmatpush1.bf16.msra.mxu1 %v3985_v32  ;;  %v4077_v31 = vld [vmem:[#allocation5 + $0x4a8] ss:$16 sps:$4 sm:$0xff]   ;;  %v4082_v32 = vld [vmem:[#allocation5 + $0x4c4] ss:$16 sps:$4 sm:$0xff]  }
  0xa5   :  { %1726 = vmatprep.subr.bf16.mxu0 %v3990_v33  ;;  %1890 = vmatprep.subr.bf16.mxu1 %v3993_v34  ;;  %v4085_v33 = vld [vmem:[#allocation5 + $0x4cc] ss:$16 sps:$4 sm:$0xff]   ;;  %v4080_v34 = vld [vmem:[#allocation5 + $0x4c0] ss:$16 sps:$4 sm:$0xff]  }
  0xa8   :  { %1727 = vmatpush1.bf16.msra.mxu0 %v3988_v35  ;;  %1891 = vmatpush1.bf16.msra.mxu1 %v3991_v36  ;;  %v4083_v35 = vld [vmem:[#allocation5 + $0x4c8] ss:$16 sps:$4 sm:$0xff]   ;;  %v4088_v36 = vld [vmem:[#allocation5 + $0x4e4] ss:$16 sps:$4 sm:$0xff]  }
  0xa9   :  { %1728 = vmatprep.subr.bf16.mxu0 %v3996_v37  ;;  %1892 = vmatprep.subr.bf16.mxu1 %v3999_v38  ;;  %v4091_v37 = vld [vmem:[#allocation5 + $0x4ec] ss:$16 sps:$4 sm:$0xff]   ;;  %v4086_v38 = vld [vmem:[#allocation5 + $0x4e0] ss:$16 sps:$4 sm:$0xff]  }
  0xac   :  { %1729 = vmatpush1.bf16.msra.mxu0 %v3994_v39  ;;  %1893 = vmatpush1.bf16.msra.mxu1 %v3997_v40  ;;  %v4089_v39 = vld [vmem:[#allocation5 + $0x4e8] ss:$16 sps:$4 sm:$0xff]   ;;  %v4094_v40 = vld [vmem:[#allocation5 + $0x504] ss:$16 sps:$4 sm:$0xff]  }
  0xad   :  { %1730 = vmatprep.subr.bf16.mxu0 %v4002_v41  ;;  %1894 = vmatprep.subr.bf16.mxu1 %v4005_v42  ;;  %v4097_v41 = vld [vmem:[#allocation5 + $0x50c] ss:$16 sps:$4 sm:$0xff]   ;;  %v4092_v42 = vld [vmem:[#allocation5 + $0x500] ss:$16 sps:$4 sm:$0xff]  }
  0xb0   :  { %1731 = vmatpush1.bf16.msra.mxu0 %v4000_v43  ;;  %1895 = vmatpush1.bf16.msra.mxu1 %v4003_v44  ;;  %v4095_v43 = vld [vmem:[#allocation5 + $0x508] ss:$16 sps:$4 sm:$0xff]   ;;  %v4100_v44 = vld [vmem:[#allocation5 + $0x524] ss:$16 sps:$4 sm:$0xff]  }
  0xb1   :  { %1732 = vmatprep.subr.bf16.mxu0 %v4008_v45  ;;  %1896 = vmatprep.subr.bf16.mxu1 %v4011_v46  ;;  %v4103_v45 = vld [vmem:[#allocation5 + $0x52c] ss:$16 sps:$4 sm:$0xff]   ;;  %v4098_v46 = vld [vmem:[#allocation5 + $0x520] ss:$16 sps:$4 sm:$0xff]  }
  0xb4   :  { %1733 = vmatpush1.bf16.msra.mxu0 %v4006_v47  ;;  %1897 = vmatpush1.bf16.msra.mxu1 %v4009_v48  ;;  %v4101_v47 = vld [vmem:[#allocation5 + $0x528] ss:$16 sps:$4 sm:$0xff]   ;;  %v4106_v48 = vld [vmem:[#allocation5 + $0x544] ss:$16 sps:$4 sm:$0xff]  }
  0xb5   :  { %1734 = vmatprep.subr.bf16.mxu0 %v4014_v49  ;;  %1898 = vmatprep.subr.bf16.mxu1 %v4017_v50  ;;  %v4109_v49 = vld [vmem:[#allocation5 + $0x54c] ss:$16 sps:$4 sm:$0xff]   ;;  %v4104_v50 = vld [vmem:[#allocation5 + $0x540] ss:$16 sps:$4 sm:$0xff]  }
  0xb8   :  { %1735 = vmatpush1.bf16.msra.mxu0 %v4012_v51  ;;  %1899 = vmatpush1.bf16.msra.mxu1 %v4015_v52  ;;  %v4107_v51 = vld [vmem:[#allocation5 + $0x548] ss:$16 sps:$4 sm:$0xff]   ;;  %v4112_v52 = vld [vmem:[#allocation5 + $0x564] ss:$16 sps:$4 sm:$0xff]  }
  0xb9   :  { %1736 = vmatprep.subr.bf16.mxu0 %v4020_v53  ;;  %1900 = vmatprep.subr.bf16.mxu1 %v4023_v54  ;;  %v4115_v53 = vld [vmem:[#allocation5 + $0x56c] ss:$16 sps:$4 sm:$0xff]   ;;  %v4110_v54 = vld [vmem:[#allocation5 + $0x560] ss:$16 sps:$4 sm:$0xff]  }
  0xbc   :  { %1737 = vmatpush1.bf16.msra.mxu0 %v4018_v55  ;;  %1901 = vmatpush1.bf16.msra.mxu1 %v4021_v56  ;;  %v4113_v55 = vld [vmem:[#allocation5 + $0x568] ss:$16 sps:$4 sm:$0xff]   ;;  %v4118_v56 = vld [vmem:[#allocation5 + $0x584] ss:$16 sps:$4 sm:$0xff]  }
  0xbd   :  { %1738 = vmatprep.subr.bf16.mxu0 %v4026_v57  ;;  %1902 = vmatprep.subr.bf16.mxu1 %v4029_v58  ;;  %v4121_v57 = vld [vmem:[#allocation5 + $0x58c] ss:$16 sps:$4 sm:$0xff]   ;;  %v4116_v58 = vld [vmem:[#allocation5 + $0x580] ss:$16 sps:$4 sm:$0xff]  }
  0xc0   :  { %1739 = vmatpush1.bf16.msra.mxu0 %v4024_v59  ;;  %1903 = vmatpush1.bf16.msra.mxu1 %v4027_v60  ;;  %v4119_v59 = vld [vmem:[#allocation5 + $0x588] ss:$16 sps:$4 sm:$0xff]   ;;  %v4124_v60 = vld [vmem:[#allocation5 + $0x5a4] ss:$16 sps:$4 sm:$0xff]  }
  0xc1   :  { %1740 = vmatprep.subr.bf16.mxu0 %v4032_v61  ;;  %1904 = vmatprep.subr.bf16.mxu1 %v4035_v62  ;;  %v4127_v61 = vld [vmem:[#allocation5 + $0x5ac] ss:$16 sps:$4 sm:$0xff]   ;;  %v4122_v62 = vld [vmem:[#allocation5 + $0x5a0] ss:$16 sps:$4 sm:$0xff]  }
  0xc4   :  { %1741 = vmatpush1.bf16.msra.mxu0 %v4030_v63  ;;  %1905 = vmatpush1.bf16.msra.mxu1 %v4033_v0  ;;  %v4125_v63 = vld [vmem:[#allocation5 + $0x5a8] ss:$16 sps:$4 sm:$0xff]   ;;  %v4130_v0 = vld [vmem:[#allocation5 + $0x5c4] ss:$16 sps:$4 sm:$0xff]  }
  0xc5   :  { %1742 = vmatprep.subr.bf16.mxu0 %v4038_v1  ;;  %1906 = vmatprep.subr.bf16.mxu1 %v4041_v2  ;;  %v4133_v1 = vld [vmem:[#allocation5 + $0x5cc] ss:$16 sps:$4 sm:$0xff]   ;;  %v4128_v2 = vld [vmem:[#allocation5 + $0x5c0] ss:$16 sps:$4 sm:$0xff]  }
  0xc8   :  { %1743 = vmatpush1.bf16.msra.mxu0 %v4036_v3  ;;  %1907 = vmatpush1.bf16.msra.mxu1 %v4039_v4  ;;  %v4131_v3 = vld [vmem:[#allocation5 + $0x5c8] ss:$16 sps:$4 sm:$0xff]   ;;  %v4136_v4 = vld [vmem:[#allocation5 + $0x5e4] ss:$16 sps:$4 sm:$0xff]  }
  0xc9   :  { %1753 = vmatprep.subr.bf16.mxu0 %v4046_v5  ;;  %1917 = vmatprep.subr.bf16.mxu1 %v4049_v6  ;;  %v4139_v5 = vld [vmem:[#allocation5 + $0x5ec] ss:$16 sps:$4 sm:$0xff]   ;;  %v4134_v6 = vld [vmem:[#allocation5 + $0x5e0] ss:$16 sps:$4 sm:$0xff]  }
  0xcb   :  { %1745 = vmatmul.mubr.bf16.vlgmr.msra.gmra.mrb[0].mxu0 %v3332_v7  ;;  %1909 = vmatmul.mubr.bf16.vlgmr.msra.gmra.mrb[0].mxu1 %v3332_v7  ;;  %v4137_v7 = vld [vmem:[#allocation5 + $0x5e8] ss:$16 sps:$4 sm:$0xff]  }
  0xcc   :  { %1754 = vmatpush1.bf16.msra.mxu0 %v4044_v8  ;;  %1918 = vmatpush1.bf16.msra.mxu1 %v4047_v9  ;;  %v4144_v8 = vld [vmem:[#allocation5 + $0x604] ss:$16 sps:$4 sm:$0xff]   ;;  %v4147_v9 = vld [vmem:[#allocation5 + $0x60c] ss:$16 sps:$4 sm:$0xff]  }
  0xcd   :  { %1755 = vmatprep.subr.bf16.mxu0 %v4052_v10  ;;  %1919 = vmatprep.subr.bf16.mxu1 %v4055_v12  ;;  %v4142_v10 = vld [vmem:[#allocation5 + $0x600] ss:$16 sps:$4 sm:$0xff]   ;;  %v3334_v12 = vcombine.low %v4691_v11, %v4691_v11  ;;  %v4159_v11 = vld [vmem:[#allocation5 + $0x64c] ss:$16 sps:$4 sm:$0xff]  }
  0xce   :  { %1785 = vmatprep.mubr.bf16.mxu0 %v3335_v13  ;;  %1949 = vmatprep.mubr.bf16.mxu1 %v3335_v13  ;;  %v4145_v13 = vld [vmem:[#allocation5 + $0x608] ss:$16 sps:$4 sm:$0xff]  }
  0xd0   :  { %1756 = vmatpush1.bf16.msra.mxu0 %v4050_v14  ;;  %1920 = vmatpush1.bf16.msra.mxu1 %v4053_v15  ;;  %v4697_v14 = vld [vmem:[#allocation2 + $0x18] sm:$0xff]  ;;  %v4150_v15 = vld [vmem:[#allocation5 + $0x624] ss:$16 sps:$4 sm:$0xff]  }
  0xd1   :  { %1757 = vmatprep.subr.bf16.mxu0 %v4058_v16  ;;  %1921 = vmatprep.subr.bf16.mxu1 %v4061_v17  ;;  %v4153_v16 = vld [vmem:[#allocation5 + $0x62c] ss:$16 sps:$4 sm:$0xff]   ;;  %v3337_v17 = vcombine.high %v4697_v14, %v4697_v14 }
  0xd4   :  { %1758 = vmatpush1.bf16.msra.mxu0 %v4056_v18  ;;  %1922 = vmatpush1.bf16.msra.mxu1 %v4059_v19  ;;  %v4148_v18 = vld [vmem:[#allocation5 + $0x620] ss:$16 sps:$4 sm:$0xff]   ;;  %v4151_v19 = vld [vmem:[#allocation5 + $0x628] ss:$16 sps:$4 sm:$0xff]  }
  0xd5   :  { %1759 = vmatprep.subr.bf16.mxu0 %v4064_v20  ;;  %1923 = vmatprep.subr.bf16.mxu1 %v4067_v21  ;;  %v4156_v20 = vld [vmem:[#allocation5 + $0x644] ss:$16 sps:$4 sm:$0xff]   ;;  %v4154_v21 = vld [vmem:[#allocation5 + $0x640] ss:$16 sps:$4 sm:$0xff]  }
  0xd8   :  { %1760 = vmatpush1.bf16.msra.mxu0 %v4062_v22  ;;  %1924 = vmatpush1.bf16.msra.mxu1 %v4065_v23  ;;  %v4157_v22 = vld [vmem:[#allocation5 + $0x648] ss:$16 sps:$4 sm:$0xff]   ;;  %v4162_v23 = vld [vmem:[#allocation5 + $0x664] ss:$16 sps:$4 sm:$0xff]  }
  0xd9   :  { %1761 = vmatprep.subr.bf16.mxu0 %v4070_v24  ;;  %1925 = vmatprep.subr.bf16.mxu1 %v4073_v25  ;;  %v4165_v24 = vld [vmem:[#allocation5 + $0x66c] ss:$16 sps:$4 sm:$0xff]   ;;  %v4160_v25 = vld [vmem:[#allocation5 + $0x660] ss:$16 sps:$4 sm:$0xff]  }
  0xdc   :  { %1762 = vmatpush1.bf16.msra.mxu0 %v4068_v26  ;;  %1926 = vmatpush1.bf16.msra.mxu1 %v4071_v27  ;;  %v4163_v26 = vld [vmem:[#allocation5 + $0x668] ss:$16 sps:$4 sm:$0xff]   ;;  %v4168_v27 = vld [vmem:[#allocation5 + $0x684] ss:$16 sps:$4 sm:$0xff]  }
  0xdd   :  { %1763 = vmatprep.subr.bf16.mxu0 %v4076_v28  ;;  %1927 = vmatprep.subr.bf16.mxu1 %v4079_v29  ;;  %v4171_v28 = vld [vmem:[#allocation5 + $0x68c] ss:$16 sps:$4 sm:$0xff]   ;;  %v4166_v29 = vld [vmem:[#allocation5 + $0x680] ss:$16 sps:$4 sm:$0xff]  }
  0xe0   :  { %1764 = vmatpush1.bf16.msra.mxu0 %v4074_v30  ;;  %1928 = vmatpush1.bf16.msra.mxu1 %v4077_v31  ;;  %v4169_v30 = vld [vmem:[#allocation5 + $0x688] ss:$16 sps:$4 sm:$0xff]   ;;  %v4174_v31 = vld [vmem:[#allocation5 + $0x6a4] ss:$16 sps:$4 sm:$0xff]  }
  0xe1   :  { %1765 = vmatprep.subr.bf16.mxu0 %v4082_v32  ;;  %1929 = vmatprep.subr.bf16.mxu1 %v4085_v33  ;;  %v4177_v32 = vld [vmem:[#allocation5 + $0x6ac] ss:$16 sps:$4 sm:$0xff]   ;;  %v4172_v33 = vld [vmem:[#allocation5 + $0x6a0] ss:$16 sps:$4 sm:$0xff]  }
  0xe4   :  { %1766 = vmatpush1.bf16.msra.mxu0 %v4080_v34  ;;  %1930 = vmatpush1.bf16.msra.mxu1 %v4083_v35  ;;  %v4175_v34 = vld [vmem:[#allocation5 + $0x6a8] ss:$16 sps:$4 sm:$0xff]   ;;  %v4180_v35 = vld [vmem:[#allocation5 + $0x6c4] ss:$16 sps:$4 sm:$0xff]  }
  0xe5   :  { %1767 = vmatprep.subr.bf16.mxu0 %v4088_v36  ;;  %1931 = vmatprep.subr.bf16.mxu1 %v4091_v37  ;;  %v4183_v36 = vld [vmem:[#allocation5 + $0x6cc] ss:$16 sps:$4 sm:$0xff]   ;;  %v4178_v37 = vld [vmem:[#allocation5 + $0x6c0] ss:$16 sps:$4 sm:$0xff]  }
  0xe8   :  { %1768 = vmatpush1.bf16.msra.mxu0 %v4086_v38  ;;  %1932 = vmatpush1.bf16.msra.mxu1 %v4089_v39  ;;  %v4181_v38 = vld [vmem:[#allocation5 + $0x6c8] ss:$16 sps:$4 sm:$0xff]   ;;  %v4186_v39 = vld [vmem:[#allocation5 + $0x6e4] ss:$16 sps:$4 sm:$0xff]  }
  0xe9   :  { %1769 = vmatprep.subr.bf16.mxu0 %v4094_v40  ;;  %1933 = vmatprep.subr.bf16.mxu1 %v4097_v41  ;;  %v4189_v40 = vld [vmem:[#allocation5 + $0x6ec] ss:$16 sps:$4 sm:$0xff]   ;;  %v4184_v41 = vld [vmem:[#allocation5 + $0x6e0] ss:$16 sps:$4 sm:$0xff]  }
  0xec   :  { %1770 = vmatpush1.bf16.msra.mxu0 %v4092_v42  ;;  %1934 = vmatpush1.bf16.msra.mxu1 %v4095_v43  ;;  %v4187_v42 = vld [vmem:[#allocation5 + $0x6e8] ss:$16 sps:$4 sm:$0xff]   ;;  %v4192_v43 = vld [vmem:[#allocation5 + $0x704] ss:$16 sps:$4 sm:$0xff]  }
  0xed   :  { %1771 = vmatprep.subr.bf16.mxu0 %v4100_v44  ;;  %1935 = vmatprep.subr.bf16.mxu1 %v4103_v45  ;;  %v4195_v44 = vld [vmem:[#allocation5 + $0x70c] ss:$16 sps:$4 sm:$0xff]   ;;  %v4190_v45 = vld [vmem:[#allocation5 + $0x700] ss:$16 sps:$4 sm:$0xff]  }
  0xf0   :  { %1772 = vmatpush1.bf16.msra.mxu0 %v4098_v46  ;;  %1936 = vmatpush1.bf16.msra.mxu1 %v4101_v47  ;;  %v4193_v46 = vld [vmem:[#allocation5 + $0x708] ss:$16 sps:$4 sm:$0xff]   ;;  %v4198_v47 = vld [vmem:[#allocation5 + $0x724] ss:$16 sps:$4 sm:$0xff]  }
  0xf1   :  { %1773 = vmatprep.subr.bf16.mxu0 %v4106_v48  ;;  %1937 = vmatprep.subr.bf16.mxu1 %v4109_v49  ;;  %v4201_v48 = vld [vmem:[#allocation5 + $0x72c] ss:$16 sps:$4 sm:$0xff]   ;;  %v4196_v49 = vld [vmem:[#allocation5 + $0x720] ss:$16 sps:$4 sm:$0xff]  }
  0xf4   :  { %1774 = vmatpush1.bf16.msra.mxu0 %v4104_v50  ;;  %1938 = vmatpush1.bf16.msra.mxu1 %v4107_v51  ;;  %v4199_v50 = vld [vmem:[#allocation5 + $0x728] ss:$16 sps:$4 sm:$0xff]   ;;  %v4204_v51 = vld [vmem:[#allocation5 + $0x744] ss:$16 sps:$4 sm:$0xff]  }
  0xf5   :  { %1775 = vmatprep.subr.bf16.mxu0 %v4112_v52  ;;  %1939 = vmatprep.subr.bf16.mxu1 %v4115_v53  ;;  %v4207_v52 = vld [vmem:[#allocation5 + $0x74c] ss:$16 sps:$4 sm:$0xff]   ;;  %v4202_v53 = vld [vmem:[#allocation5 + $0x740] ss:$16 sps:$4 sm:$0xff]  }
  0xf8   :  { %1776 = vmatpush1.bf16.msra.mxu0 %v4110_v54  ;;  %1940 = vmatpush1.bf16.msra.mxu1 %v4113_v55  ;;  %v4205_v54 = vld [vmem:[#allocation5 + $0x748] ss:$16 sps:$4 sm:$0xff]   ;;  %v4210_v55 = vld [vmem:[#allocation5 + $0x764] ss:$16 sps:$4 sm:$0xff]  }
  0xf9   :  { %1777 = vmatprep.subr.bf16.mxu0 %v4118_v56  ;;  %1941 = vmatprep.subr.bf16.mxu1 %v4121_v57  ;;  %v4213_v56 = vld [vmem:[#allocation5 + $0x76c] ss:$16 sps:$4 sm:$0xff]   ;;  %v4208_v57 = vld [vmem:[#allocation5 + $0x760] ss:$16 sps:$4 sm:$0xff]  }
  0xfc   :  { %1778 = vmatpush1.bf16.msra.mxu0 %v4116_v58  ;;  %1942 = vmatpush1.bf16.msra.mxu1 %v4119_v59  ;;  %v4211_v58 = vld [vmem:[#allocation5 + $0x768] ss:$16 sps:$4 sm:$0xff]   ;;  %v4216_v59 = vld [vmem:[#allocation5 + $0x784] ss:$16 sps:$4 sm:$0xff]  }
  0xfd   :  { %1779 = vmatprep.subr.bf16.mxu0 %v4124_v60  ;;  %1943 = vmatprep.subr.bf16.mxu1 %v4127_v61  ;;  %v4219_v60 = vld [vmem:[#allocation5 + $0x78c] ss:$16 sps:$4 sm:$0xff]   ;;  %v4214_v61 = vld [vmem:[#allocation5 + $0x780] ss:$16 sps:$4 sm:$0xff]  }
 0x100   :  { %1780 = vmatpush1.bf16.msra.mxu0 %v4122_v62  ;;  %1944 = vmatpush1.bf16.msra.mxu1 %v4125_v63  ;;  %v4217_v62 = vld [vmem:[#allocation5 + $0x788] ss:$16 sps:$4 sm:$0xff]   ;;  %v4222_v63 = vld [vmem:[#allocation5 + $0x7a4] ss:$16 sps:$4 sm:$0xff]  }
 0x101   :  { %1781 = vmatprep.subr.bf16.mxu0 %v4130_v0  ;;  %1945 = vmatprep.subr.bf16.mxu1 %v4133_v1  ;;  %v4225_v0 = vld [vmem:[#allocation5 + $0x7ac] ss:$16 sps:$4 sm:$0xff]   ;;  %v4220_v1 = vld [vmem:[#allocation5 + $0x7a0] ss:$16 sps:$4 sm:$0xff]  }
 0x104   :  { %1782 = vmatpush1.bf16.msra.mxu0 %v4128_v2  ;;  %1946 = vmatpush1.bf16.msra.mxu1 %v4131_v3  ;;  %v4223_v2 = vld [vmem:[#allocation5 + $0x7a8] ss:$16 sps:$4 sm:$0xff]   ;;  %v4228_v3 = vld [vmem:[#allocation5 + $0x7c4] ss:$16 sps:$4 sm:$0xff]  }
 0x105   :  { %1783 = vmatprep.subr.bf16.mxu0 %v4136_v4  ;;  %1947 = vmatprep.subr.bf16.mxu1 %v4139_v5  ;;  %v4231_v4 = vld [vmem:[#allocation5 + $0x7cc] ss:$16 sps:$4 sm:$0xff]   ;;  %v4226_v5 = vld [vmem:[#allocation5 + $0x7c0] ss:$16 sps:$4 sm:$0xff]  }
 0x108   :  { %1784 = vmatpush1.bf16.msra.mxu0 %v4134_v6  ;;  %1948 = vmatpush1.bf16.msra.mxu1 %v4137_v7  ;;  %v4229_v6 = vld [vmem:[#allocation5 + $0x7c8] ss:$16 sps:$4 sm:$0xff]   ;;  %v4234_v7 = vld [vmem:[#allocation5 + $0x7e4] ss:$16 sps:$4 sm:$0xff]  }
 0x109   :  { %1794 = vmatprep.subr.bf16.mxu0 %v4144_v8  ;;  %1958 = vmatprep.subr.bf16.mxu1 %v4147_v9  ;;  %v4237_v8 = vld [vmem:[#allocation5 + $0x7ec] ss:$16 sps:$4 sm:$0xff]   ;;  %v4232_v9 = vld [vmem:[#allocation5 + $0x7e0] ss:$16 sps:$4 sm:$0xff]  }
 0x10b   :  { %1786 = vmatmul.mubr.bf16.vlgmr.msra.gmra.mrb[0].mxu0 %v3334_v12  ;;  %1950 = vmatmul.mubr.bf16.vlgmr.msra.gmra.mrb[0].mxu1 %v3334_v12  ;;  %v4242_v12 = vld [vmem:[#allocation7 + $0x4] ss:$16 sps:$4 sm:$0xff]  }
 0x10c   :  { %1795 = vmatpush1.bf16.msra.mxu0 %v4142_v10  ;;  %1959 = vmatpush1.bf16.msra.mxu1 %v4145_v13  ;;  %v4235_v10 = vld [vmem:[#allocation5 + $0x7e8] ss:$16 sps:$4 sm:$0xff]   ;;  %v4245_v13 = vld [vmem:[#allocation7 + $0xc] ss:$16 sps:$4 sm:$0xff]  }
 0x10d   :  { %1796 = vmatprep.subr.bf16.mxu0 %v4150_v15  ;;  %1960 = vmatprep.subr.bf16.mxu1 %v4153_v16  ;;  %v3336_v15 = vcombine.low %v4697_v14, %v4697_v14  ;;  %v4240_v16 = vld [vmem:[#allocation7] ss:$16 sps:$4 sm:$0xff]  }
 0x10e   :  { %1826 = vmatprep.mubr.bf16.mxu0 %v3337_v17  ;;  %1990 = vmatprep.mubr.bf16.mxu1 %v3337_v17  ;;  %v4243_v17 = vld [vmem:[#allocation7 + $0x8] ss:$16 sps:$4 sm:$0xff]   ;;  %v4252_v14 = vld [vmem:[#allocation7 + $0x40] ss:$16 sps:$4 sm:$0xff]  }
 0x110   :  { %1797 = vmatpush1.bf16.msra.mxu0 %v4148_v18  ;;  %1961 = vmatpush1.bf16.msra.mxu1 %v4151_v19  ;;  %v4248_v18 = vld [vmem:[#allocation7 + $0x24] ss:$16 sps:$4 sm:$0xff]   ;;  %v4251_v19 = vld [vmem:[#allocation7 + $0x2c] ss:$16 sps:$4 sm:$0xff]  }
 0x111   :  { %1798 = vmatprep.subr.bf16.mxu0 %v4156_v20  ;;  %1962 = vmatprep.subr.bf16.mxu1 %v4159_v11  ;;  %v4246_v20 = vld [vmem:[#allocation7 + $0x20] ss:$16 sps:$4 sm:$0xff]   ;;  %v4249_v11 = vld [vmem:[#allocation7 + $0x28] ss:$16 sps:$4 sm:$0xff]  }
 0x114   :  { %1799 = vmatpush1.bf16.msra.mxu0 %v4154_v21  ;;  %1963 = vmatpush1.bf16.msra.mxu1 %v4157_v22  ;;  %v4254_v21 = vld [vmem:[#allocation7 + $0x44] ss:$16 sps:$4 sm:$0xff]   ;;  %v4257_v22 = vld [vmem:[#allocation7 + $0x4c] ss:$16 sps:$4 sm:$0xff]  }
 0x115   :  { %1800 = vmatprep.subr.bf16.mxu0 %v4162_v23  ;;  %1964 = vmatprep.subr.bf16.mxu1 %v4165_v24  ;;  %v4255_v23 = vld [vmem:[#allocation7 + $0x48] ss:$16 sps:$4 sm:$0xff]   ;;  %v4260_v24 = vld [vmem:[#allocation7 + $0x64] ss:$16 sps:$4 sm:$0xff]  }
 0x118   :  { %1801 = vmatpush1.bf16.msra.mxu0 %v4160_v25  ;;  %1965 = vmatpush1.bf16.msra.mxu1 %v4163_v26  ;;  %v4263_v25 = vld [vmem:[#allocation7 + $0x6c] ss:$16 sps:$4 sm:$0xff]   ;;  %v4258_v26 = vld [vmem:[#allocation7 + $0x60] ss:$16 sps:$4 sm:$0xff]  }
 0x119   :  { %1802 = vmatprep.subr.bf16.mxu0 %v4168_v27  ;;  %1966 = vmatprep.subr.bf16.mxu1 %v4171_v28  ;;  %v4261_v27 = vld [vmem:[#allocation7 + $0x68] ss:$16 sps:$4 sm:$0xff]   ;;  %v4266_v28 = vld [vmem:[#allocation7 + $0x84] ss:$16 sps:$4 sm:$0xff]  }
 0x11c   :  { %1803 = vmatpush1.bf16.msra.mxu0 %v4166_v29  ;;  %1967 = vmatpush1.bf16.msra.mxu1 %v4169_v30  ;;  %v4269_v29 = vld [vmem:[#allocation7 + $0x8c] ss:$16 sps:$4 sm:$0xff]   ;;  %v4264_v30 = vld [vmem:[#allocation7 + $0x80] ss:$16 sps:$4 sm:$0xff]  }
 0x11d   :  { %1804 = vmatprep.subr.bf16.mxu0 %v4174_v31  ;;  %1968 = vmatprep.subr.bf16.mxu1 %v4177_v32  ;;  %v4267_v31 = vld [vmem:[#allocation7 + $0x88] ss:$16 sps:$4 sm:$0xff]   ;;  %v4272_v32 = vld [vmem:[#allocation7 + $0xa4] ss:$16 sps:$4 sm:$0xff]  }
 0x120   :  { %1805 = vmatpush1.bf16.msra.mxu0 %v4172_v33  ;;  %1969 = vmatpush1.bf16.msra.mxu1 %v4175_v34  ;;  %v4275_v33 = vld [vmem:[#allocation7 + $0xac] ss:$16 sps:$4 sm:$0xff]   ;;  %v4270_v34 = vld [vmem:[#allocation7 + $0xa0] ss:$16 sps:$4 sm:$0xff]  }
 0x121   :  { %1806 = vmatprep.subr.bf16.mxu0 %v4180_v35  ;;  %1970 = vmatprep.subr.bf16.mxu1 %v4183_v36  ;;  %v4273_v35 = vld [vmem:[#allocation7 + $0xa8] ss:$16 sps:$4 sm:$0xff]   ;;  %v4278_v36 = vld [vmem:[#allocation7 + $0xc4] ss:$16 sps:$4 sm:$0xff]  }
 0x124   :  { %1807 = vmatpush1.bf16.msra.mxu0 %v4178_v37  ;;  %1971 = vmatpush1.bf16.msra.mxu1 %v4181_v38  ;;  %v4281_v37 = vld [vmem:[#allocation7 + $0xcc] ss:$16 sps:$4 sm:$0xff]   ;;  %v4276_v38 = vld [vmem:[#allocation7 + $0xc0] ss:$16 sps:$4 sm:$0xff]  }
 0x125   :  { %1808 = vmatprep.subr.bf16.mxu0 %v4186_v39  ;;  %1972 = vmatprep.subr.bf16.mxu1 %v4189_v40  ;;  %v4279_v39 = vld [vmem:[#allocation7 + $0xc8] ss:$16 sps:$4 sm:$0xff]   ;;  %v4284_v40 = vld [vmem:[#allocation7 + $0xe4] ss:$16 sps:$4 sm:$0xff]  }
 0x128   :  { %1809 = vmatpush1.bf16.msra.mxu0 %v4184_v41  ;;  %1973 = vmatpush1.bf16.msra.mxu1 %v4187_v42  ;;  %v4287_v41 = vld [vmem:[#allocation7 + $0xec] ss:$16 sps:$4 sm:$0xff]   ;;  %v4282_v42 = vld [vmem:[#allocation7 + $0xe0] ss:$16 sps:$4 sm:$0xff]  }
 0x129   :  { %1810 = vmatprep.subr.bf16.mxu0 %v4192_v43  ;;  %1974 = vmatprep.subr.bf16.mxu1 %v4195_v44  ;;  %v4285_v43 = vld [vmem:[#allocation7 + $0xe8] ss:$16 sps:$4 sm:$0xff]   ;;  %v4290_v44 = vld [vmem:[#allocation7 + $0x104] ss:$16 sps:$4 sm:$0xff]  }
 0x12c   :  { %1811 = vmatpush1.bf16.msra.mxu0 %v4190_v45  ;;  %1975 = vmatpush1.bf16.msra.mxu1 %v4193_v46  ;;  %v4293_v45 = vld [vmem:[#allocation7 + $0x10c] ss:$16 sps:$4 sm:$0xff]   ;;  %v4288_v46 = vld [vmem:[#allocation7 + $0x100] ss:$16 sps:$4 sm:$0xff]  }
 0x12d   :  { %1812 = vmatprep.subr.bf16.mxu0 %v4198_v47  ;;  %1976 = vmatprep.subr.bf16.mxu1 %v4201_v48  ;;  %v4291_v47 = vld [vmem:[#allocation7 + $0x108] ss:$16 sps:$4 sm:$0xff]   ;;  %v4296_v48 = vld [vmem:[#allocation7 + $0x124] ss:$16 sps:$4 sm:$0xff]  }
 0x130   :  { %1813 = vmatpush1.bf16.msra.mxu0 %v4196_v49  ;;  %1977 = vmatpush1.bf16.msra.mxu1 %v4199_v50  ;;  %v4299_v49 = vld [vmem:[#allocation7 + $0x12c] ss:$16 sps:$4 sm:$0xff]   ;;  %v4294_v50 = vld [vmem:[#allocation7 + $0x120] ss:$16 sps:$4 sm:$0xff]  }
 0x131   :  { %1814 = vmatprep.subr.bf16.mxu0 %v4204_v51  ;;  %1978 = vmatprep.subr.bf16.mxu1 %v4207_v52  ;;  %v4297_v51 = vld [vmem:[#allocation7 + $0x128] ss:$16 sps:$4 sm:$0xff]   ;;  %v4302_v52 = vld [vmem:[#allocation7 + $0x144] ss:$16 sps:$4 sm:$0xff]  }
 0x134   :  { %1815 = vmatpush1.bf16.msra.mxu0 %v4202_v53  ;;  %1979 = vmatpush1.bf16.msra.mxu1 %v4205_v54  ;;  %v4305_v53 = vld [vmem:[#allocation7 + $0x14c] ss:$16 sps:$4 sm:$0xff]   ;;  %v4300_v54 = vld [vmem:[#allocation7 + $0x140] ss:$16 sps:$4 sm:$0xff]  }
 0x135   :  { %1816 = vmatprep.subr.bf16.mxu0 %v4210_v55  ;;  %1980 = vmatprep.subr.bf16.mxu1 %v4213_v56  ;;  %v4303_v55 = vld [vmem:[#allocation7 + $0x148] ss:$16 sps:$4 sm:$0xff]   ;;  %v4308_v56 = vld [vmem:[#allocation7 + $0x164] ss:$16 sps:$4 sm:$0xff]  }
 0x138   :  { %1817 = vmatpush1.bf16.msra.mxu0 %v4208_v57  ;;  %1981 = vmatpush1.bf16.msra.mxu1 %v4211_v58  ;;  %v4311_v57 = vld [vmem:[#allocation7 + $0x16c] ss:$16 sps:$4 sm:$0xff]   ;;  %v4306_v58 = vld [vmem:[#allocation7 + $0x160] ss:$16 sps:$4 sm:$0xff]  }
 0x139   :  { %1818 = vmatprep.subr.bf16.mxu0 %v4216_v59  ;;  %1982 = vmatprep.subr.bf16.mxu1 %v4219_v60  ;;  %v4309_v59 = vld [vmem:[#allocation7 + $0x168] ss:$16 sps:$4 sm:$0xff]   ;;  %v4314_v60 = vld [vmem:[#allocation7 + $0x184] ss:$16 sps:$4 sm:$0xff]  }
 0x13c   :  { %1819 = vmatpush1.bf16.msra.mxu0 %v4214_v61  ;;  %1983 = vmatpush1.bf16.msra.mxu1 %v4217_v62  ;;  %v4317_v61 = vld [vmem:[#allocation7 + $0x18c] ss:$16 sps:$4 sm:$0xff]   ;;  %v4312_v62 = vld [vmem:[#allocation7 + $0x180] ss:$16 sps:$4 sm:$0xff]  }
 0x13d   :  { %1820 = vmatprep.subr.bf16.mxu0 %v4222_v63  ;;  %1984 = vmatprep.subr.bf16.mxu1 %v4225_v0  ;;  %v4315_v63 = vld [vmem:[#allocation7 + $0x188] ss:$16 sps:$4 sm:$0xff]   ;;  %v4320_v0 = vld [vmem:[#allocation7 + $0x1a4] ss:$16 sps:$4 sm:$0xff]  }
 0x140   :  { %1821 = vmatpush1.bf16.msra.mxu0 %v4220_v1  ;;  %1985 = vmatpush1.bf16.msra.mxu1 %v4223_v2  ;;  %v4323_v1 = vld [vmem:[#allocation7 + $0x1ac] ss:$16 sps:$4 sm:$0xff]   ;;  %v4318_v2 = vld [vmem:[#allocation7 + $0x1a0] ss:$16 sps:$4 sm:$0xff]  }
 0x141   :  { %1822 = vmatprep.subr.bf16.mxu0 %v4228_v3  ;;  %1986 = vmatprep.subr.bf16.mxu1 %v4231_v4  ;;  %v4321_v3 = vld [vmem:[#allocation7 + $0x1a8] ss:$16 sps:$4 sm:$0xff]   ;;  %v4326_v4 = vld [vmem:[#allocation7 + $0x1c4] ss:$16 sps:$4 sm:$0xff]  }
 0x144   :  { %1823 = vmatpush1.bf16.msra.mxu0 %v4226_v5  ;;  %1987 = vmatpush1.bf16.msra.mxu1 %v4229_v6  ;;  %v4329_v5 = vld [vmem:[#allocation7 + $0x1cc] ss:$16 sps:$4 sm:$0xff]   ;;  %v4324_v6 = vld [vmem:[#allocation7 + $0x1c0] ss:$16 sps:$4 sm:$0xff]  }
 0x145   :  { %1824 = vmatprep.subr.bf16.mxu0 %v4234_v7  ;;  %1988 = vmatprep.subr.bf16.mxu1 %v4237_v8  ;;  %v4327_v7 = vld [vmem:[#allocation7 + $0x1c8] ss:$16 sps:$4 sm:$0xff]   ;;  %v4332_v8 = vld [vmem:[#allocation7 + $0x1e4] ss:$16 sps:$4 sm:$0xff]  }
 0x148   :  { %1825 = vmatpush1.bf16.msra.mxu0 %v4232_v9  ;;  %1989 = vmatpush1.bf16.msra.mxu1 %v4235_v10  ;;  %v4335_v9 = vld [vmem:[#allocation7 + $0x1ec] ss:$16 sps:$4 sm:$0xff]   ;;  %v4330_v10 = vld [vmem:[#allocation7 + $0x1e0] ss:$16 sps:$4 sm:$0xff]  }
 0x149   :  { %2797 = vmatprep.subr.bf16.mxu0 %v4242_v12  ;;  %2879 = vmatprep.subr.bf16.mxu1 %v4245_v13  ;;  %v4333_v12 = vld [vmem:[#allocation7 + $0x1e8] ss:$16 sps:$4 sm:$0xff]   ;;  %v4338_v13 = vld [vmem:[#allocation7 + $0x204] ss:$16 sps:$4 sm:$0xff]  }
 0x14b   :  { %1827 = vmatmul.mubr.bf16.vlgmr.msra.gmra.mrb[0].mxu0 %v3336_v15  ;;  %1991 = vmatmul.mubr.bf16.vlgmr.msra.gmra.mrb[0].mxu1 %v3336_v15  ;;  %v4341_v15 = vld [vmem:[#allocation7 + $0x20c] ss:$16 sps:$4 sm:$0xff]  }
 0x14c   :  { %2798 = vmatpush1.bf16.msra.mxu0 %v4240_v16  ;;  %2880 = vmatpush1.bf16.msra.mxu1 %v4243_v17  ;;  %v343_v16 = vlaneseq }
 0x14d   :  { %2799 = vmatprep.subr.bf16.mxu0 %v4248_v18  ;;  %2881 = vmatprep.subr.bf16.mxu1 %v4251_v19  ;;  %v4709_v19 = vld [vmem:[%s4757_s2] sm:$0xf] }
 0x14e   :  { %v4703_v17 = vshrl.u32 %v343_v16, 7  ;;  %v4398_v16 = vld [vmem:[#allocation7 + $0x344] ss:$16 sps:$4 sm:$0xff]  }
 0x150   :  { %2800 = vmatpush1.bf16.msra.mxu0 %v4246_v20  ;;  %2882 = vmatpush1.bf16.msra.mxu1 %v4249_v11  ;;  %v345_v18 = vsub.s32 0, %v4703_v17  ;;  %v349_v20 = vsub.s32 1, %v4703_v17  ;;  %v357_v11 = vsub.s32 3, %v4703_v17 }
 0x151   :  { %2801 = vmatprep.subr.bf16.mxu0 %v4254_v21  ;;  %2883 = vmatprep.subr.bf16.mxu1 %v4257_v22 }
 0x152   :  { %v346_v21 = vrot.slane %v4709_v19, %v345_v18  ;;  %v350_v22 = vrot.slane %v4709_v19, %v349_v20 }
 0x154   :  { %2802 = vmatpush1.bf16.msra.mxu0 %v4252_v14  ;;  %2884 = vmatpush1.bf16.msra.mxu1 %v4255_v23  ;;  %v358_v14 = vrot.slane %v4709_v19, %v357_v11 }
 0x155   :  { %2803 = vmatprep.subr.bf16.mxu0 %v4260_v24  ;;  %2885 = vmatprep.subr.bf16.mxu1 %v4263_v25 }
 0x158   :  { %2804 = vmatpush1.bf16.msra.mxu0 %v4258_v26  ;;  %2886 = vmatpush1.bf16.msra.mxu1 %v4261_v27 }
 0x159   :  { %2805 = vmatprep.subr.bf16.mxu0 %v4266_v28  ;;  %2887 = vmatprep.subr.bf16.mxu1 %v4269_v29 }
 0x15c   :  { %2806 = vmatpush1.bf16.msra.mxu0 %v4264_v30  ;;  %2888 = vmatpush1.bf16.msra.mxu1 %v4267_v31 }
 0x15d   :  { %2807 = vmatprep.subr.bf16.mxu0 %v4272_v32  ;;  %2889 = vmatprep.subr.bf16.mxu1 %v4275_v33 }
 0x160   :  { %2808 = vmatpush1.bf16.msra.mxu0 %v4270_v34  ;;  %2890 = vmatpush1.bf16.msra.mxu1 %v4273_v35 }
 0x161   :  { %2809 = vmatprep.subr.bf16.mxu0 %v4278_v36  ;;  %2891 = vmatprep.subr.bf16.mxu1 %v4281_v37 }
 0x164   :  { %2810 = vmatpush1.bf16.msra.mxu0 %v4276_v38  ;;  %2892 = vmatpush1.bf16.msra.mxu1 %v4279_v39  ;;  %v4336_v38 = vld [vmem:[#allocation7 + $0x200] ss:$16 sps:$4 sm:$0xff]   ;;  %v4339_v39 = vld [vmem:[#allocation7 + $0x208] ss:$16 sps:$4 sm:$0xff]  }
 0x165   :  { %2811 = vmatprep.subr.bf16.mxu0 %v4284_v40  ;;  %2893 = vmatprep.subr.bf16.mxu1 %v4287_v41  ;;  %v4344_v41 = vld [vmem:[#allocation7 + $0x224] ss:$16 sps:$4 sm:$0xff]  }
 0x168   :  { %2812 = vmatpush1.bf16.msra.mxu0 %v4282_v42  ;;  %2894 = vmatpush1.bf16.msra.mxu1 %v4285_v43  ;;  %v4347_v42 = vld [vmem:[#allocation7 + $0x22c] ss:$16 sps:$4 sm:$0xff]  }
 0x169   :  { %2813 = vmatprep.subr.bf16.mxu0 %v4290_v44  ;;  %2895 = vmatprep.subr.bf16.mxu1 %v4293_v45  ;;  %v4342_v44 = vld [vmem:[#allocation7 + $0x220] ss:$16 sps:$4 sm:$0xff]   ;;  %v4345_v45 = vld [vmem:[#allocation7 + $0x228] ss:$16 sps:$4 sm:$0xff]  }
 0x16c   :  { %2814 = vmatpush1.bf16.msra.mxu0 %v4288_v46  ;;  %2896 = vmatpush1.bf16.msra.mxu1 %v4291_v47  ;;  %v4350_v46 = vld [vmem:[#allocation7 + $0x244] ss:$16 sps:$4 sm:$0xff]   ;;  %v4353_v47 = vld [vmem:[#allocation7 + $0x24c] ss:$16 sps:$4 sm:$0xff]  }
 0x16d   :  { %2815 = vmatprep.subr.bf16.mxu0 %v4296_v48  ;;  %2897 = vmatprep.subr.bf16.mxu1 %v4299_v49  ;;  %v4348_v48 = vld [vmem:[#allocation7 + $0x240] ss:$16 sps:$4 sm:$0xff]   ;;  %v4351_v49 = vld [vmem:[#allocation7 + $0x248] ss:$16 sps:$4 sm:$0xff]  }
 0x170   :  { %2816 = vmatpush1.bf16.msra.mxu0 %v4294_v50  ;;  %2898 = vmatpush1.bf16.msra.mxu1 %v4297_v51  ;;  %v4356_v50 = vld [vmem:[#allocation7 + $0x264] ss:$16 sps:$4 sm:$0xff]   ;;  %v4359_v51 = vld [vmem:[#allocation7 + $0x26c] ss:$16 sps:$4 sm:$0xff]  }
 0x171   :  { %2817 = vmatprep.subr.bf16.mxu0 %v4302_v52  ;;  %2899 = vmatprep.subr.bf16.mxu1 %v4305_v53  ;;  %v4354_v52 = vld [vmem:[#allocation7 + $0x260] ss:$16 sps:$4 sm:$0xff]   ;;  %v4357_v53 = vld [vmem:[#allocation7 + $0x268] ss:$16 sps:$4 sm:$0xff]  }
 0x174   :  { %2818 = vmatpush1.bf16.msra.mxu0 %v4300_v54  ;;  %2900 = vmatpush1.bf16.msra.mxu1 %v4303_v55  ;;  %v4362_v54 = vld [vmem:[#allocation7 + $0x284] ss:$16 sps:$4 sm:$0xff]   ;;  %v4365_v55 = vld [vmem:[#allocation7 + $0x28c] ss:$16 sps:$4 sm:$0xff]  }
 0x175   :  { %2819 = vmatprep.subr.bf16.mxu0 %v4308_v56  ;;  %2901 = vmatprep.subr.bf16.mxu1 %v4311_v57  ;;  %v4360_v56 = vld [vmem:[#allocation7 + $0x280] ss:$16 sps:$4 sm:$0xff]   ;;  %v4363_v57 = vld [vmem:[#allocation7 + $0x288] ss:$16 sps:$4 sm:$0xff]  }
 0x178   :  { %2820 = vmatpush1.bf16.msra.mxu0 %v4306_v58  ;;  %2902 = vmatpush1.bf16.msra.mxu1 %v4309_v59  ;;  %v4368_v58 = vld [vmem:[#allocation7 + $0x2a4] ss:$16 sps:$4 sm:$0xff]   ;;  %v4371_v59 = vld [vmem:[#allocation7 + $0x2ac] ss:$16 sps:$4 sm:$0xff]  }
 0x179   :  { %2821 = vmatprep.subr.bf16.mxu0 %v4314_v60  ;;  %2903 = vmatprep.subr.bf16.mxu1 %v4317_v61  ;;  %v4366_v60 = vld [vmem:[#allocation7 + $0x2a0] ss:$16 sps:$4 sm:$0xff]   ;;  %v4369_v61 = vld [vmem:[#allocation7 + $0x2a8] ss:$16 sps:$4 sm:$0xff]  }
 0x17c   :  { %2822 = vmatpush1.bf16.msra.mxu0 %v4312_v62  ;;  %2904 = vmatpush1.bf16.msra.mxu1 %v4315_v63  ;;  %v4374_v62 = vld [vmem:[#allocation7 + $0x2c4] ss:$16 sps:$4 sm:$0xff]   ;;  %v4377_v63 = vld [vmem:[#allocation7 + $0x2cc] ss:$16 sps:$4 sm:$0xff]  }
 0x17d   :  { %2823 = vmatprep.subr.bf16.mxu0 %v4320_v0  ;;  %2905 = vmatprep.subr.bf16.mxu1 %v4323_v1  ;;  %v4372_v0 = vld [vmem:[#allocation7 + $0x2c0] ss:$16 sps:$4 sm:$0xff]   ;;  %v4375_v1 = vld [vmem:[#allocation7 + $0x2c8] ss:$16 sps:$4 sm:$0xff]  }
 0x180   :  { %2824 = vmatpush1.bf16.msra.mxu0 %v4318_v2  ;;  %2906 = vmatpush1.bf16.msra.mxu1 %v4321_v3  ;;  %v4380_v2 = vld [vmem:[#allocation7 + $0x2e4] ss:$16 sps:$4 sm:$0xff]   ;;  %v4383_v3 = vld [vmem:[#allocation7 + $0x2ec] ss:$16 sps:$4 sm:$0xff]  }
 0x181   :  { %2825 = vmatprep.subr.bf16.mxu0 %v4326_v4  ;;  %2907 = vmatprep.subr.bf16.mxu1 %v4329_v5  ;;  %v4378_v4 = vld [vmem:[#allocation7 + $0x2e0] ss:$16 sps:$4 sm:$0xff]   ;;  %v4381_v5 = vld [vmem:[#allocation7 + $0x2e8] ss:$16 sps:$4 sm:$0xff]  }
 0x184   :  { %2826 = vmatpush1.bf16.msra.mxu0 %v4324_v6  ;;  %2908 = vmatpush1.bf16.msra.mxu1 %v4327_v7  ;;  %v4386_v6 = vld [vmem:[#allocation7 + $0x304] ss:$16 sps:$4 sm:$0xff]   ;;  %v4389_v7 = vld [vmem:[#allocation7 + $0x30c] ss:$16 sps:$4 sm:$0xff]  }
 0x185   :  { %2827 = vmatprep.subr.bf16.mxu0 %v4332_v8  ;;  %2909 = vmatprep.subr.bf16.mxu1 %v4335_v9  ;;  %v4384_v8 = vld [vmem:[#allocation7 + $0x300] ss:$16 sps:$4 sm:$0xff]   ;;  %v4387_v9 = vld [vmem:[#allocation7 + $0x308] ss:$16 sps:$4 sm:$0xff]  }
 0x188   :  { %2828 = vmatpush1.bf16.msra.mxu0 %v4330_v10  ;;  %2910 = vmatpush1.bf16.msra.mxu1 %v4333_v12  ;;  %v4392_v10 = vld [vmem:[#allocation7 + $0x324] ss:$16 sps:$4 sm:$0xff]   ;;  %v4395_v12 = vld [vmem:[#allocation7 + $0x32c] ss:$16 sps:$4 sm:$0xff]  }
 0x189   :  { %2838 = vmatprep.subr.bf16.mxu0 %v4338_v13  ;;  %2920 = vmatprep.subr.bf16.mxu1 %v4341_v15  ;;  %v4390_v13 = vld [vmem:[#allocation7 + $0x320] ss:$16 sps:$4 sm:$0xff]   ;;  %v4393_v15 = vld [vmem:[#allocation7 + $0x328] ss:$16 sps:$4 sm:$0xff]  }
 0x21e   :  { %v1828_v23 = vpop.f32.mrb[0].mxu0  ;;  %v4722_v24 = vpop.f32.mrb[0].mxu1 }
 0x21f   :  { %v3799_v25 = vadd.f32 %v1828_v23, %v346_v21  ;;  %v1830_v26 = vpop.f32.mrb[1].mxu0  ;;  %v1994_v27 = vpop.f32.mrb[1].mxu1  ;;  %v4401_v21 = vld [vmem:[#allocation7 + $0x34c] ss:$16 sps:$4 sm:$0xff]   ;;  %v4404_v23 = vld [vmem:[#allocation7 + $0x364] ss:$16 sps:$4 sm:$0xff]  }
 0x220   :  { %v3800_v28 = vadd.f32 %v1830_v26, %v350_v22  ;;  %v3802_v29 = vadd.f32 %v1994_v27, %v358_v14  ;;  %v1832_v30 = vpop.f32.mrb[2].mxu0  ;;  %v1996_v31 = vpop.f32.mrb[2].mxu1  ;;  %v4396_v22 = vld [vmem:[#allocation7 + $0x340] ss:$16 sps:$4 sm:$0xff]   ;;  %v4399_v14 = vld [vmem:[#allocation7 + $0x348] ss:$16 sps:$4 sm:$0xff]  }
 0x221   :  { %v1999_v32 = vmax.f32 %v3799_v25, 0.0  ;;  %v1833_v33 = vpop.f32.mrb[3].mxu0  ;;  %v1997_v34 = vpop.f32.mrb[3].mxu1  ;;  %v4407_v25 = vld [vmem:[#allocation7 + $0x36c] ss:$16 sps:$4 sm:$0xff]  }
 0x222   :  { %v2000_v35 = vmax.f32 %v3800_v28, 0.0  ;;  %v2002_v36 = vmax.f32 %v3802_v29, 0.0  ;;  %v4402_v26 = vld [vmem:[#allocation7 + $0x360] ss:$16 sps:$4 sm:$0xff]   ;;  %v4405_v27 = vld [vmem:[#allocation7 + $0x368] ss:$16 sps:$4 sm:$0xff]  }
 0x223   :  { %v2003_v40 = vpack.c.bf16 %v1999_v32, %v1999_v32  ;;  %v4410_v28 = vld [vmem:[#allocation7 + $0x384] ss:$16 sps:$4 sm:$0xff]   ;;  %v4413_v29 = vld [vmem:[#allocation7 + $0x38c] ss:$16 sps:$4 sm:$0xff]   ;;  %v4408_v30 = vld [vmem:[#allocation7 + $0x380] ss:$16 sps:$4 sm:$0xff]  }
 0x224   :  { %v2004_v37 = vpack.c.bf16 %v2000_v35, %v2000_v35  ;;  %v2006_v43 = vpack.c.bf16 %v2002_v36, %v2002_v36  ;;  %v4411_v31 = vld [vmem:[#allocation7 + $0x388] ss:$16 sps:$4 sm:$0xff]   ;;  %v353_v32 = vsub.s32 2, %v4703_v17  ;;  %v4416_v33 = vld [vmem:[#allocation7 + $0x3a4] ss:$16 sps:$4 sm:$0xff]  }
 0x225   :  { %v4419_v34 = vld [vmem:[#allocation7 + $0x3ac] ss:$16 sps:$4 sm:$0xff]   ;;  %v4414_v35 = vld [vmem:[#allocation7 + $0x3a0] ss:$16 sps:$4 sm:$0xff]   ;;  %v4417_v36 = vld [vmem:[#allocation7 + $0x3a8] ss:$16 sps:$4 sm:$0xff]  }
 0x226   :  { %2829 = vmatprep.mubr.bf16.mxu0 %v2004_v37  ;;  %2911 = vmatprep.mubr.bf16.mxu1 %v2004_v37  ;;  %v354_v37 = vrot.slane %v4709_v19, %v353_v32  ;;  %v4432_v19 = vld [vmem:[#allocation8 + $0x40] sm:$0xff]  }
 0x227   :  { %2830 = vmatmul.mubr.bf16.vlgmr.msra.gmra.mrb[4].mxu0 %v2003_v40  ;;  %2912 = vmatmul.mubr.bf16.vlgmr.msra.gmra.mrb[4].mxu1 %v2003_v40  ;;  %v4420_v40 = vld [vmem:[#allocation7 + $0x3c0] ss:$16 sps:$4 sm:$0xff]  }
 0x228   :  { %2839 = vmatpush1.bf16.msra.mxu0 %v4336_v38  ;;  %2921 = vmatpush1.bf16.msra.mxu1 %v4339_v39  ;;  %v4422_v38 = vld [vmem:[#allocation7 + $0x3c4] ss:$16 sps:$4 sm:$0xff]   ;;  %v4425_v39 = vld [vmem:[#allocation7 + $0x3cc] ss:$16 sps:$4 sm:$0xff]  }
 0x229   :  { %2870 = vmatprep.mubr.bf16.mxu0 %v2006_v43  ;;  %2952 = vmatprep.mubr.bf16.mxu1 %v2006_v43  ;;  %v4428_v43 = vld [vmem:[#allocation7 + $0x3e4] ss:$16 sps:$4 sm:$0xff]  }
 0x22a   :  { %2840 = vmatprep.subr.bf16.mxu0 %v4344_v41  ;;  %2922 = vmatprep.subr.bf16.mxu1 %v4347_v42  ;;  %v4423_v41 = vld [vmem:[#allocation7 + $0x3c8] ss:$16 sps:$4 sm:$0xff]   ;;  %v3801_v42 = vadd.f32 %v4722_v24, %v354_v37 }
 0x22b   :  { %v4436_v24 = vld [vmem:[#allocation8 + $0x48] sm:$0xff]  }
 0x22c   :  { %2841 = vmatpush1.bf16.msra.mxu0 %v4342_v44  ;;  %2923 = vmatpush1.bf16.msra.mxu1 %v4345_v45  ;;  %v4431_v44 = vld [vmem:[#allocation7 + $0x3ec] ss:$16 sps:$4 sm:$0xff]   ;;  %v4426_v45 = vld [vmem:[#allocation7 + $0x3e0] ss:$16 sps:$4 sm:$0xff]  }
 0x22d   :  { %2842 = vmatprep.subr.bf16.mxu0 %v4350_v46  ;;  %2924 = vmatprep.subr.bf16.mxu1 %v4353_v47  ;;  %v4429_v46 = vld [vmem:[#allocation7 + $0x3e8] ss:$16 sps:$4 sm:$0xff]   ;;  %v2001_v47 = vmax.f32 %v3801_v42, 0.0 }
 0x230   :  { %2843 = vmatpush1.bf16.msra.mxu0 %v4348_v48  ;;  %2925 = vmatpush1.bf16.msra.mxu1 %v4351_v49  ;;  %v4433_v48 = vld [vmem:[#allocation8 + $0xc0] sm:$0xff]  }
 0x231   :  { %2844 = vmatprep.subr.bf16.mxu0 %v4356_v50  ;;  %2926 = vmatprep.subr.bf16.mxu1 %v4359_v51  ;;  %v4434_v49 = vld [vmem:[#allocation8] sm:$0xff]   ;;  %v2005_v51 = vpack.c.bf16 %v2001_v47, %v2001_v47 }
 0x232   :  { %v4435_v50 = vld [vmem:[#allocation8 + $0x80] sm:$0xff]  }
 0x234   :  { %2845 = vmatpush1.bf16.msra.mxu0 %v4354_v52  ;;  %2927 = vmatpush1.bf16.msra.mxu1 %v4357_v53  ;;  %v4437_v52 = vld [vmem:[#allocation8 + $0xc8] sm:$0xff]  }
 0x235   :  { %2846 = vmatprep.subr.bf16.mxu0 %v4362_v54  ;;  %2928 = vmatprep.subr.bf16.mxu1 %v4365_v55  ;;  %v4438_v53 = vld [vmem:[#allocation8 + $0x8] sm:$0xff]   ;;  %v4440_v55 = vld [vmem:[#allocation8 + $0x50] sm:$0xff]  }
 0x236   :  { %v4439_v54 = vld [vmem:[#allocation8 + $0x88] sm:$0xff]  }
 0x238   :  { %2847 = vmatpush1.bf16.msra.mxu0 %v4360_v56  ;;  %2929 = vmatpush1.bf16.msra.mxu1 %v4363_v57  ;;  %v4441_v56 = vld [vmem:[#allocation8 + $0xd0] sm:$0xff]  }
 0x239   :  { %2848 = vmatprep.subr.bf16.mxu0 %v4368_v58  ;;  %2930 = vmatprep.subr.bf16.mxu1 %v4371_v59  ;;  %v4442_v57 = vld [vmem:[#allocation8 + $0x10] sm:$0xff]   ;;  %v4444_v59 = vld [vmem:[#allocation8 + $0x58] sm:$0xff]  }
 0x23a   :  { %v4443_v58 = vld [vmem:[#allocation8 + $0x90] sm:$0xff]  }
 0x23c   :  { %2849 = vmatpush1.bf16.msra.mxu0 %v4366_v60  ;;  %2931 = vmatpush1.bf16.msra.mxu1 %v4369_v61  ;;  %v4445_v60 = vld [vmem:[#allocation8 + $0xd8] sm:$0xff]  }
 0x23d   :  { %2850 = vmatprep.subr.bf16.mxu0 %v4374_v62  ;;  %2932 = vmatprep.subr.bf16.mxu1 %v4377_v63  ;;  %v4446_v61 = vld [vmem:[#allocation8 + $0x18] sm:$0xff]   ;;  %v4448_v63 = vld [vmem:[#allocation8 + $0x60] sm:$0xff]  }
 0x23e   :  { %v4447_v62 = vld [vmem:[#allocation8 + $0x98] sm:$0xff]  }
 0x240   :  { %2851 = vmatpush1.bf16.msra.mxu0 %v4372_v0  ;;  %2933 = vmatpush1.bf16.msra.mxu1 %v4375_v1  ;;  %v4449_v0 = vld [vmem:[#allocation8 + $0xe0] sm:$0xff]  }
 0x241   :  { %2852 = vmatprep.subr.bf16.mxu0 %v4380_v2  ;;  %2934 = vmatprep.subr.bf16.mxu1 %v4383_v3  ;;  %v4450_v1 = vld [vmem:[#allocation8 + $0x20] sm:$0xff]   ;;  %v4452_v3 = vld [vmem:[#allocation8 + $0x68] sm:$0xff]  }
 0x242   :  { %v4451_v2 = vld [vmem:[#allocation8 + $0xa0] sm:$0xff]  }
 0x244   :  { %2853 = vmatpush1.bf16.msra.mxu0 %v4378_v4  ;;  %2935 = vmatpush1.bf16.msra.mxu1 %v4381_v5  ;;  %v4453_v4 = vld [vmem:[#allocation8 + $0xe8] sm:$0xff]  }
 0x245   :  { %2854 = vmatprep.subr.bf16.mxu0 %v4386_v6  ;;  %2936 = vmatprep.subr.bf16.mxu1 %v4389_v7  ;;  %v4454_v5 = vld [vmem:[#allocation8 + $0x28] sm:$0xff]   ;;  %v4456_v7 = vld [vmem:[#allocation8 + $0x70] sm:$0xff]  }
 0x246   :  { %v4455_v6 = vld [vmem:[#allocation8 + $0xa8] sm:$0xff]  }
 0x248   :  { %2855 = vmatpush1.bf16.msra.mxu0 %v4384_v8  ;;  %2937 = vmatpush1.bf16.msra.mxu1 %v4387_v9  ;;  %v4457_v8 = vld [vmem:[#allocation8 + $0xf0] sm:$0xff]  }
 0x249   :  { %2856 = vmatprep.subr.bf16.mxu0 %v4392_v10  ;;  %2938 = vmatprep.subr.bf16.mxu1 %v4395_v12  ;;  %v4458_v9 = vld [vmem:[#allocation8 + $0x30] sm:$0xff]   ;;  %v4460_v12 = vld [vmem:[#allocation8 + $0x78] sm:$0xff]  }
 0x24a   :  { %v4459_v10 = vld [vmem:[#allocation8 + $0xb0] sm:$0xff]  }
 0x24c   :  { %2857 = vmatpush1.bf16.msra.mxu0 %v4390_v13  ;;  %2939 = vmatpush1.bf16.msra.mxu1 %v4393_v15  ;;  %v4461_v13 = vld [vmem:[#allocation8 + $0xf8] sm:$0xff]  }
 0x24d   :  { %2858 = vmatprep.subr.bf16.mxu0 %v4398_v16  ;;  %2940 = vmatprep.subr.bf16.mxu1 %v4401_v21  ;;  %v4462_v15 = vld [vmem:[#allocation8 + $0x38] sm:$0xff]   ;;  %v2135_v21 = vld [vmem:[%s4759_s4] sm:$0xf] }
 0x24e   :  { %v4463_v16 = vld [vmem:[#allocation8 + $0xb8] sm:$0xff]  }
 0x250   :  { %2859 = vmatpush1.bf16.msra.mxu0 %v4396_v22  ;;  %2941 = vmatpush1.bf16.msra.mxu1 %v4399_v14  ;;  %v2140_v22 = vrot.slane %v2135_v21, %v345_v18  ;;  %v2148_v14 = vrot.slane %v2135_v21, %v353_v32 }
 0x251   :  { %2860 = vmatprep.subr.bf16.mxu0 %v4404_v23  ;;  %2942 = vmatprep.subr.bf16.mxu1 %v4407_v25  ;;  %v2144_v23 = vrot.slane %v2135_v21, %v349_v20  ;;  %v2152_v25 = vrot.slane %v2135_v21, %v357_v11 }
 0x254   :  { %2861 = vmatpush1.bf16.msra.mxu0 %v4402_v26  ;;  %2943 = vmatpush1.bf16.msra.mxu1 %v4405_v27 }
 0x255   :  { %2862 = vmatprep.subr.bf16.mxu0 %v4410_v28  ;;  %2944 = vmatprep.subr.bf16.mxu1 %v4413_v29 }
 0x258   :  { %2863 = vmatpush1.bf16.msra.mxu0 %v4408_v30  ;;  %2945 = vmatpush1.bf16.msra.mxu1 %v4411_v31 }
 0x259   :  { %2864 = vmatprep.subr.bf16.mxu0 %v4416_v33  ;;  %2946 = vmatprep.subr.bf16.mxu1 %v4419_v34 }
 0x25c   :  { %2865 = vmatpush1.bf16.msra.mxu0 %v4414_v35  ;;  %2947 = vmatpush1.bf16.msra.mxu1 %v4417_v36 }
 0x25d   :  { %2866 = vmatprep.subr.bf16.mxu0 %v4422_v38  ;;  %2948 = vmatprep.subr.bf16.mxu1 %v4425_v39 }
 0x260   :  { %2867 = vmatpush1.bf16.msra.mxu0 %v4420_v40  ;;  %2949 = vmatpush1.bf16.msra.mxu1 %v4423_v41 }
 0x261   :  { %2868 = vmatprep.subr.bf16.mxu0 %v4428_v43  ;;  %2950 = vmatprep.subr.bf16.mxu1 %v4431_v44  ;;  %v3722_v44 = vld [vmem:[%s4761_s6] ss:$0 sm:$0xff] }
 0x264   :  { %2869 = vmatpush1.bf16.msra.mxu0 %v4426_v45  ;;  %2951 = vmatpush1.bf16.msra.mxu1 %v4429_v46 }
 0x265   :  { %3755 = vmatprep.subr.bf16.mxu0 %v4432_v19  ;;  %3777 = vmatprep.subr.bf16.mxu1 %v4433_v48 }
 0x267   :  { %2871 = vmatmul.mubr.bf16.vlgmr.msra.gmra.mrb[4].mxu0 %v2005_v51  ;;  %2953 = vmatmul.mubr.bf16.vlgmr.msra.gmra.mrb[4].mxu1 %v2005_v51 }
 0x268   :  { %3756 = vmatpush3.bf16.msra.mxu0 %v4434_v49  ;;  %3778 = vmatpush3.bf16.msra.mxu1 %v4435_v50 }
 0x269   :  { %3757 = vmatprep.subr.bf16.mxu0 %v4436_v24  ;;  %3779 = vmatprep.subr.bf16.mxu1 %v4437_v52 }
 0x26c   :  { %3758 = vmatpush3.bf16.msra.mxu0 %v4438_v53  ;;  %3780 = vmatpush3.bf16.msra.mxu1 %v4439_v54 }
 0x26d   :  { %3759 = vmatprep.subr.bf16.mxu0 %v4440_v55  ;;  %3781 = vmatprep.subr.bf16.mxu1 %v4441_v56 }
 0x270   :  { %3760 = vmatpush3.bf16.msra.mxu0 %v4442_v57  ;;  %3782 = vmatpush3.bf16.msra.mxu1 %v4443_v58 }
 0x271   :  { %3761 = vmatprep.subr.bf16.mxu0 %v4444_v59  ;;  %3783 = vmatprep.subr.bf16.mxu1 %v4445_v60 }
 0x274   :  { %3762 = vmatpush3.bf16.msra.mxu0 %v4446_v61  ;;  %3784 = vmatpush3.bf16.msra.mxu1 %v4447_v62 }
 0x275   :  { %3763 = vmatprep.subr.bf16.mxu0 %v4448_v63  ;;  %3785 = vmatprep.subr.bf16.mxu1 %v4449_v0 }
 0x278   :  { %3764 = vmatpush3.bf16.msra.mxu0 %v4450_v1  ;;  %3786 = vmatpush3.bf16.msra.mxu1 %v4451_v2 }
 0x279   :  { %3765 = vmatprep.subr.bf16.mxu0 %v4452_v3  ;;  %3787 = vmatprep.subr.bf16.mxu1 %v4453_v4 }
 0x27c   :  { %3766 = vmatpush3.bf16.msra.mxu0 %v4454_v5  ;;  %3788 = vmatpush3.bf16.msra.mxu1 %v4455_v6 }
 0x27d   :  { %3767 = vmatprep.subr.bf16.mxu0 %v4456_v7  ;;  %3789 = vmatprep.subr.bf16.mxu1 %v4457_v8 }
 0x280   :  { %3768 = vmatpush3.bf16.msra.mxu0 %v4458_v9  ;;  %3790 = vmatpush3.bf16.msra.mxu1 %v4459_v10 }
 0x281   :  { %3769 = vmatprep.subr.bf16.mxu0 %v4460_v12  ;;  %3791 = vmatprep.subr.bf16.mxu1 %v4461_v13 }
 0x284   :  { %3770 = vmatpush3.bf16.msra.mxu0 %v4462_v15  ;;  %3792 = vmatpush3.bf16.msra.mxu1 %v4463_v16 }
 0x33a   :  { %v2872_v26 = vpop.f32.mrb[4].mxu0  ;;  %v2954_v27 = vpop.f32.mrb[4].mxu1 }
 0x33b   :  { %v3803_v28 = vadd.f32 %v2872_v26, %v2140_v22  ;;  %v3805_v29 = vadd.f32 %v2954_v27, %v2148_v14  ;;  %v2874_v30 = vpop.f32.mrb[5].mxu0  ;;  %v2956_v31 = vpop.f32.mrb[5].mxu1 }
 0x33c   :  { %v3804_v33 = vadd.f32 %v2874_v30, %v2144_v23  ;;  %v3806_v34 = vadd.f32 %v2956_v31, %v2152_v25  ;;  %v2876_v35 = vpop.f32.mrb[6].mxu0  ;;  %v2958_v36 = vpop.f32.mrb[6].mxu1 }
 0x33d   :  { %v2961_v18 = vmax.f32 %v3803_v28, 0.0  ;;  %v2963_v37 = vmax.f32 %v3805_v29, 0.0  ;;  %v2877_v38 = vpop.f32.mrb[7].mxu0  ;;  %v2959_v32 = vpop.f32.mrb[7].mxu1 }
 0x33e   :  { %v2962_v39 = vmax.f32 %v3804_v33, 0.0  ;;  %v2964_v40 = vmax.f32 %v3806_v34, 0.0 }
 0x33f   :  { %v2965_v17 = vpack.c.bf16 %v2961_v18, %v2961_v18  ;;  %v2967_v11 = vpack.c.bf16 %v2963_v37, %v2963_v37 }
 0x340   :  { %v2966_v20 = vpack.c.bf16 %v2962_v39, %v2962_v39  ;;  %v2968_v41 = vpack.c.bf16 %v2964_v40, %v2964_v40 }
 0x342   :  { %3264 = vmatprep.mubr.bf16.mxu0 %v2966_v20  ;;  %3304 = vmatprep.mubr.bf16.mxu1 %v2968_v41 }
 0x343   :  { %3265 = vmatmul.mubr.bf16.vlgmr.msra.gmra.mrb[8].mxu0 %v2965_v17  ;;  %3305 = vmatmul.mubr.bf16.vlgmr.msra.gmra.mrb[8].mxu1 %v2967_v11 }
 0x416   :  { %v3771_v42 = vpop.f32.mrb[8].mxu0  ;;  %v3793_v43 = vpop.f32.mrb[8].mxu1 }
 0x417   :  { %v3772_v45 = vpop.f32.mrb[9].mxu0  ;;  %v3794_v46 = vpop.f32.mrb[9].mxu1 }
 0x418   :  { %v3773_v47 = vadd.f32 %v3772_v45, %v3771_v42  ;;  %v3795_v19 = vadd.f32 %v3794_v46, %v3793_v43  ;;  %v3774_v48 = vpop.f32.mrb[10].mxu0  ;;  %v3796_v49 = vpop.f32.mrb[10].mxu1 }
 0x419   :  { %v3775_v50 = vpop.f32.mrb[11].mxu0  ;;  %v3797_v51 = vpop.f32.mrb[11].mxu1 }
 0x41a   :  { %v3267_v24 = vadd.f32 %v3773_v47, %v3722_v44 }
 0x41c   :  { %v3307_v52 = vadd.f32 %v3795_v19, %v3267_v24 }
 0x41e   :  { %3312 = vst [vmem:[#allocation10] sm:$0xff] %v3307_v52 }
 0x41f   :  { %4563 = shalt.err (!%p4560_p8)
}
 0x420   :  { %s4564_s10 = scalar_lea.hbm %s4762_s7, 128 }
 0x421   :  { %p4565_p9 = scmp.ne.s32.totalorder %s4762_s7, %s4564_s10  ;;  %p4568_p10 = scmp.lt.u32.totalorder %s4564_s10, %s4762_s7 }
 0x423   :  { %p4570_p11 = pnand %p4568_p10, %p4565_p9 }
 0x425   :  { %4573 = shalt.err (!%p4570_p11)
}
 0x426   :  { %3322 = dma.vmem_to_hbm [thread:$0]  %s3320_s30, 128, %s4762_s7, [#allocation4]  }
 0x427   :  { %4580 = dma.done.wait [#allocation4], 128  }
 0x428   :  { %4581 = vsyncadd [#allocation4], 4294967168 }
 0x429   :  { %3326 = vsyncpa [#allocation3], 1 }
 0x42a   :  { %3327 = vsyncpa [#allocation6], 1 }
 0x42b   :  { %3328 = vsyncpa [#allocation9], 1 }
 0x42c   :  { %3329 = vsyncpa [#allocation4], 1 }

</bundles_post_ra>
